<compile_context>
chip_gen: v6e
topology: v6e:2x2x1
jax: 0.10.0
libtpu: 0.0.40
codegen_flags: <defaults>
</compile_context>

<pallas_src>
import functools
import math

import jax
import jax.numpy as jnp
from jax import lax
from jax.experimental import pallas as pl
from jax.experimental.pallas import tpu as pltpu


def _attention_kernel(x_ref, mask_ref,
                      wq_ref, bq_ref, wk_ref, bk_ref, wv_ref, bv_ref,
                      wo_ref, bo_ref, gamma_ref, beta_ref,
                      out_ref, probs_ref,
                      q_scr, k_scr, v_scr, ctx_scr,
                      *, num_heads, head_dim, ln_eps):
    # x_ref: (N,H)  mask_ref: (1,N)  w*_ref: (H,H) [out,in]  b*/gamma/beta: (1,H)
    # out_ref: (N,H)  probs_ref: (N,N)  scratch: (heads,N,d) each (native dtype)
    h = pl.program_id(1)
    dn = (((1,), (1,)), ((), ()))   # contract feature axes: y = a @ W^T (nn.Linear layout)

    # ---- once per batch: full-width QKV projections into head-major scratch ----
    @pl.when(h == 0)
    def _project_qkv():
        x = x_ref[...]                                   # native dtype -> MXU

        def proj(w_ref, b_ref):
            y = lax.dot_general(x, w_ref[...], dn, preferred_element_type=jnp.float32)
            return (y + b_ref[...].astype(jnp.float32)).astype(q_scr.dtype)

        q = proj(wq_ref, bq_ref)                         # (N, H)
        k = proj(wk_ref, bk_ref)
        v = proj(wv_ref, bv_ref)
        # One static relayout pass into head-major scratch; later per-head access
        # is a free leading-axis index (no dynamic lane slicing in the head steps).
        for hh in range(num_heads):
            sl = slice(hh * head_dim, (hh + 1) * head_dim)
            q_scr[hh] = q[:, sl]
            k_scr[hh] = k[:, sl]
            v_scr[hh] = v[:, sl]

    # ---- per-head attention for head h (native-dtype MXU operands, f32 accum) ----
    q_h = q_scr[h]                                       # (N, d)
    k_h = k_scr[h]
    v_h = v_scr[h]

    scores = lax.dot_general(q_h, k_h, dn, preferred_element_type=jnp.float32)   # (N, N)
    scores = scores * jnp.float32(1.0 / math.sqrt(head_dim))
    scores = scores + mask_ref[...].astype(jnp.float32)  # (1,N) broadcasts over queries

    m = jnp.max(scores, axis=-1, keepdims=True)
    e = jnp.exp(scores - m)
    denom = jnp.sum(e, axis=-1, keepdims=True)
    p = e * pl.reciprocal(denom, approx=True)            # EUP reciprocal (no VPU divide)
    probs_ref[...] = p.astype(probs_ref.dtype)

    ctx_h = jnp.dot(p.astype(v_h.dtype), v_h, preferred_element_type=jnp.float32)
    ctx_scr[h] = ctx_h.astype(ctx_scr.dtype)

    # ---- last head: single full-width output projection + residual + LayerNorm ----
    @pl.when(h == num_heads - 1)
    def _epilogue():
        ctx = jnp.concatenate([ctx_scr[hh] for hh in range(num_heads)], axis=-1)  # (N, H)
        y = lax.dot_general(ctx, wo_ref[...], dn, preferred_element_type=jnp.float32)
        y = y + bo_ref[...].astype(jnp.float32) + x_ref[...].astype(jnp.float32)
        u = jnp.mean(y, axis=-1, keepdims=True)
        var = jnp.mean(jnp.square(y - u), axis=-1, keepdims=True)
        y = (y - u) * lax.rsqrt(var + jnp.float32(ln_eps))
        y = gamma_ref[...].astype(jnp.float32) * y + beta_ref[...].astype(jnp.float32)
        out_ref[...] = y.astype(out_ref.dtype)


def _pick_vmem_limit_bytes():
    """~75% of physical VMEM: ~48 MiB on v7x (64 MiB parts), ~96 MiB on v5e/v6e."""
    cap = 64 * 1024 * 1024
    try:
        cap = int(pltpu.get_tpu_info().vmem_capacity_bytes)
    except Exception:
        pass
    return int(min(cap * 3 // 4, 100 * 1024 * 1024))


def bert_image_attention(hidden_states, attention_mask,
                         wq, bq, wk, bk, wv, bv, wo, bo, gamma, beta,
                         *, num_heads, ln_eps=1e-12, probs_dtype=None):
    """hidden_states: [B,T,S,F]; attention_mask: additive mask with B*T*S elements.

    Weights in nn.Linear layout: w* [out, in], b* [out]; gamma/beta [F].
    Returns (attention_output [B,T,S,F], attention_probs [B,heads,N,N]).
    Pass probs_dtype=jnp.bfloat16 to halve probs HBM writeback at large N.
    """
    B, T, S, F = hidden_states.shape
    N = T * S
    H = F
    assert H % num_heads == 0, "hidden size must be divisible by num heads"
    d = H // num_heads
    if probs_dtype is None:
        probs_dtype = hidden_states.dtype

    x3d = hidden_states.reshape(B, N, H)                    # free reshape
    mask3d = attention_mask.reshape(B, 1, N).astype(jnp.float32)

    bq2, bk2, bv2, bo2 = (t.reshape(1, H) for t in (bq, bk, bv, bo))
    gamma2 = gamma.reshape(1, H)
    beta2 = beta.reshape(1, H)

    kernel = functools.partial(_attention_kernel,
                               num_heads=num_heads, head_dim=d, ln_eps=ln_eps)

    itemsize = jnp.dtype(hidden_states.dtype).itemsize
    flops = B * (8 * N * H * H + 4 * N * N * H)             # qkv + scores + ctx + wo
    transcendentals = B * num_heads * N * N                 # exp in softmax
    bytes_accessed = (2 * B * N * H) * itemsize \
        + B * num_heads * N * N * jnp.dtype(probs_dtype).itemsize \
        + (4 * H * H + 6 * H) * jnp.dtype(wq.dtype).itemsize \
        + B * N * 4
    cost = pl.CostEstimate(flops=flops, transcendentals=transcendentals,
                           bytes_accessed=bytes_accessed)

    # Constant-index weights/biases: fetched once, kept resident, single-buffered
    # so the pipeline does not double their VMEM footprint.
    weight_spec = pl.BlockSpec((H, H), lambda b, h: (0, 0), pipeline_mode=pl.Buffered(1))
    vec_spec = pl.BlockSpec((1, H), lambda b, h: (0, 0), pipeline_mode=pl.Buffered(1))

    out3d, probs = pl.pallas_call(
        kernel,
        out_shape=(
            jax.ShapeDtypeStruct((B, N, H), hidden_states.dtype),
            jax.ShapeDtypeStruct((B, num_heads, N, N), probs_dtype),
        ),
        grid_spec=pltpu.PrefetchScalarGridSpec(
            num_scalar_prefetch=0,
            grid=(B, num_heads),
            in_specs=[
                pl.BlockSpec((None, N, H), lambda b, h: (b, 0, 0)),   # x (resident per batch)
                pl.BlockSpec((None, 1, N), lambda b, h: (b, 0, 0)),   # additive mask
                weight_spec, vec_spec,                                 # Wq, bq
                weight_spec, vec_spec,                                 # Wk, bk
                weight_spec, vec_spec,                                 # Wv, bv
                weight_spec, vec_spec,                                 # Wo, bo
                vec_spec, vec_spec,                                    # gamma, beta
            ],
            out_specs=(
                pl.BlockSpec((None, N, H), lambda b, h: (b, 0, 0)),          # out (last head)
                pl.BlockSpec((None, None, N, N), lambda b, h: (b, h, 0, 0)), # per-head probs
            ),
            scratch_shapes=[
                pltpu.VMEM((num_heads, N, d), hidden_states.dtype),   # q (head-major)
                pltpu.VMEM((num_heads, N, d), hidden_states.dtype),   # k
                pltpu.VMEM((num_heads, N, d), hidden_states.dtype),   # v
                pltpu.VMEM((num_heads, N, d), hidden_states.dtype),   # ctx
            ],
        ),
        compiler_params=pltpu.CompilerParams(
            dimension_semantics=("parallel", "arbitrary"),
            vmem_limit_bytes=_pick_vmem_limit_bytes(),
        ),
        cost_estimate=cost,
    )(x3d, mask3d, wq, bq2, wk, bk2, wv, bv2, wo, bo2, gamma2, beta2)

    return out3d.reshape(B, T, S, H), probs


def _reference(hidden_states, attention_mask,
               wq, bq, wk, bk, wv, bv, wo, bo, gamma, beta,
               *, num_heads, ln_eps=1e-12):
    B, T, S, F = hidden_states.shape
    N = T * S
    d = F // num_heads
    x = hidden_states.reshape(B, N, F)
    q = x @ wq.T + bq
    k = x @ wk.T + bk
    v = x @ wv.T + bv

    def split(t):
        return t.reshape(B, N, num_heads, d).transpose(0, 2, 1, 3)

    qh, kh, vh = split(q), split(k), split(v)
    scores = jnp.einsum('bhqd,bhkd->bhqk', qh, kh) / math.sqrt(d)
    scores = scores + attention_mask.reshape(B, 1, 1, N)
    probs = jax.nn.softmax(scores, axis=-1)
    ctx = jnp.einsum('bhqk,bhkd->bhqd', probs, vh)
    ctx = ctx.transpose(0, 2, 1, 3).reshape(B, N, F)
    y = ctx @ wo.T + bo + x
    u = y.mean(-1, keepdims=True)
    s = ((y - u) ** 2).mean(-1, keepdims=True)
    y = (y - u) / jnp.sqrt(s + ln_eps)
    y = gamma * y + beta
    return y.reshape(B, T, S, F), probs


if __name__ == "__main__":
    # Small but layout-representative config: B=2, T=4, S=8 (N=32), H=128, 4 heads (d=32)
    B, T, S = 2, 4, 8
    H, num_heads = 128, 4
    N = T * S

    key = jax.random.PRNGKey(0)
    keys = jax.random.split(key, 12)

    hidden_states = jax.random.normal(keys[0], (B, T, S, H), dtype=jnp.float32)
    # BERT-style additive mask: 0.0 for visible positions, -10000.0 for masked.
    visible = (jax.random.uniform(keys[1], (B, T, S)) < 0.85).astype(jnp.float32)
    attention_mask = (1.0 - visible) * -10000.0

    def lin(kw, kb):
        w = jax.random.normal(kw, (H, H), dtype=jnp.float32) * 0.02
        b = jax.random.normal(kb, (H,), dtype=jnp.float32) * 0.02
        return w, b

    wq, bq = lin(keys[2], keys[3])
    wk, bk = lin(keys[4], keys[5])
    wv, bv = lin(keys[6], keys[7])
    wo, bo = lin(keys[8], keys[9])
    gamma = 1.0 + 0.1 * jax.random.normal(keys[10], (H,), dtype=jnp.float32)
    beta = 0.1 * jax.random.normal(keys[11], (H,), dtype=jnp.float32)

    out, probs = bert_image_attention(hidden_states, attention_mask,
                                      wq, bq, wk, bk, wv, bv, wo, bo,
                                      gamma, beta, num_heads=num_heads)
    out = jax.block_until_ready(out)
    probs = jax.block_until_ready(probs)

    ref_out, ref_probs = _reference(hidden_states, attention_mask,
                                    wq, bq, wk, bk, wv, bv, wo, bo,
                                    gamma, beta, num_heads=num_heads)

    assert out.shape == (B, T, S, H)
    assert probs.shape == (B, num_heads, N, N)
    # Tolerances leave room for the EUP approximate-reciprocal softmax normalization.
    assert jnp.allclose(out, ref_out, atol=5e-3, rtol=5e-3), \
        float(jnp.max(jnp.abs(out - ref_out)))
    assert jnp.allclose(probs, ref_probs, atol=2e-3, rtol=0), \
        float(jnp.max(jnp.abs(probs - ref_probs)))

    print("KERNEL_OK")
</pallas_src>

<mosaic_0001>
module attributes {stable_mosaic.version = 11 : i64} {
  func.func @_attention_kernel(%arg0: i32, %arg1: i32, %arg2: memref<1x32x128xf32, #tpu.memory_space<vmem>>, %arg3: memref<1x1x32xf32, #tpu.memory_space<vmem>>, %arg4: memref<128x128xf32, #tpu.memory_space<vmem>>, %arg5: memref<1x128xf32, #tpu.memory_space<vmem>>, %arg6: memref<128x128xf32, #tpu.memory_space<vmem>>, %arg7: memref<1x128xf32, #tpu.memory_space<vmem>>, %arg8: memref<128x128xf32, #tpu.memory_space<vmem>>, %arg9: memref<1x128xf32, #tpu.memory_space<vmem>>, %arg10: memref<128x128xf32, #tpu.memory_space<vmem>>, %arg11: memref<1x128xf32, #tpu.memory_space<vmem>>, %arg12: memref<1x128xf32, #tpu.memory_space<vmem>>, %arg13: memref<1x128xf32, #tpu.memory_space<vmem>>, %arg14: memref<1x32x128xf32, #tpu.memory_space<vmem>>, %arg15: memref<1x1x32x32xf32, #tpu.memory_space<vmem>>, %arg16: memref<4x32x32xf32, #tpu.memory_space<vmem>>, %arg17: memref<4x32x32xf32, #tpu.memory_space<vmem>>, %arg18: memref<4x32x32xf32, #tpu.memory_space<vmem>>, %arg19: memref<4x32x32xf32, #tpu.memory_space<vmem>>) attributes {dimension_semantics = [#tpu.dimension_semantics<parallel>, #tpu.dimension_semantics<arbitrary>], iteration_bounds = array<i64: 2, 4>, scalar_prefetch = 0 : i64, scratch_operands = 4 : i64, tpu.core_type = #tpu.core_type<tc>, window_params = [{transform_indices = @transform_0, window_bounds = array<i64: 1, 32, 128>}, {transform_indices = @transform_1, window_bounds = array<i64: 1, 1, 32>}, {pipeline_mode = #tpu.pipeline_mode<synchronous>, transform_indices = @transform_2, window_bounds = array<i64: 128, 128>}, {pipeline_mode = #tpu.pipeline_mode<synchronous>, transform_indices = @transform_3, window_bounds = array<i64: 1, 128>}, {pipeline_mode = #tpu.pipeline_mode<synchronous>, transform_indices = @transform_4, window_bounds = array<i64: 128, 128>}, {pipeline_mode = #tpu.pipeline_mode<synchronous>, transform_indices = @transform_5, window_bounds = array<i64: 1, 128>}, {pipeline_mode = #tpu.pipeline_mode<synchronous>, transform_indices = @transform_6, window_bounds = array<i64: 128, 128>}, {pipeline_mode = #tpu.pipeline_mode<synchronous>, transform_indices = @transform_7, window_bounds = array<i64: 1, 128>}, {pipeline_mode = #tpu.pipeline_mode<synchronous>, transform_indices = @transform_8, window_bounds = array<i64: 128, 128>}, {pipeline_mode = #tpu.pipeline_mode<synchronous>, transform_indices = @transform_9, window_bounds = array<i64: 1, 128>}, {pipeline_mode = #tpu.pipeline_mode<synchronous>, transform_indices = @transform_10, window_bounds = array<i64: 1, 128>}, {pipeline_mode = #tpu.pipeline_mode<synchronous>, transform_indices = @transform_11, window_bounds = array<i64: 1, 128>}, {transform_indices = @transform_12, window_bounds = array<i64: 1, 32, 128>}, {transform_indices = @transform_13, window_bounds = array<i64: 1, 1, 32, 32>}]} {
    %c0_i32 = arith.constant 0 : i32
    %0 = arith.cmpi eq, %arg1, %c0_i32 : i32
    %1 = arith.extui %0 : i1 to i32
    %c0_i32_0 = arith.constant 0 : i32
    %2 = arith.cmpi ne, %1, %c0_i32_0 : i32
    scf.if %2 {
      %c0_20 = arith.constant 0 : index
      %c0_21 = arith.constant 0 : index
      %c0_22 = arith.constant 0 : index
      %40 = vector.load %arg2[%c0_20, %c0_21, %c0_22] : memref<1x32x128xf32, #tpu.memory_space<vmem>>, vector<1x32x128xf32>
      %41 = vector.shape_cast %40 : vector<1x32x128xf32> to vector<32x128xf32>
      %c0_23 = arith.constant 0 : index
      %c0_24 = arith.constant 0 : index
      %42 = vector.load %arg4[%c0_23, %c0_24] : memref<128x128xf32, #tpu.memory_space<vmem>>, vector<128x128xf32>
      %cst_25 = arith.constant dense<0.000000e+00> : vector<32x128xf32>
      %43 = tpu.matmul %41, %42, %cst_25 {dimension_numbers = #tpu.dot_dimension_numbers<[1], [1], [0], [0], [0, 0, 1, 0], [], []>} : vector<32x128xf32>, vector<128x128xf32>, vector<32x128xf32> -> vector<32x128xf32>
      %c0_26 = arith.constant 0 : index
      %c0_27 = arith.constant 0 : index
      %44 = vector.load %arg5[%c0_26, %c0_27] : memref<1x128xf32, #tpu.memory_space<vmem>>, vector<1x128xf32>
      %45 = vector.broadcast %44 : vector<1x128xf32> to vector<32x128xf32>
      %46 = arith.addf %43, %45 : vector<32x128xf32>
      %c0_28 = arith.constant 0 : index
      %c0_29 = arith.constant 0 : index
      %47 = vector.load %arg6[%c0_28, %c0_29] : memref<128x128xf32, #tpu.memory_space<vmem>>, vector<128x128xf32>
      %cst_30 = arith.constant dense<0.000000e+00> : vector<32x128xf32>
      %48 = tpu.matmul %41, %47, %cst_30 {dimension_numbers = #tpu.dot_dimension_numbers<[1], [1], [0], [0], [0, 0, 1, 0], [], []>} : vector<32x128xf32>, vector<128x128xf32>, vector<32x128xf32> -> vector<32x128xf32>
      %c0_31 = arith.constant 0 : index
      %c0_32 = arith.constant 0 : index
      %49 = vector.load %arg7[%c0_31, %c0_32] : memref<1x128xf32, #tpu.memory_space<vmem>>, vector<1x128xf32>
      %50 = vector.broadcast %49 : vector<1x128xf32> to vector<32x128xf32>
      %51 = arith.addf %48, %50 : vector<32x128xf32>
      %c0_33 = arith.constant 0 : index
      %c0_34 = arith.constant 0 : index
      %52 = vector.load %arg8[%c0_33, %c0_34] : memref<128x128xf32, #tpu.memory_space<vmem>>, vector<128x128xf32>
      %cst_35 = arith.constant dense<0.000000e+00> : vector<32x128xf32>
      %53 = tpu.matmul %41, %52, %cst_35 {dimension_numbers = #tpu.dot_dimension_numbers<[1], [1], [0], [0], [0, 0, 1, 0], [], []>} : vector<32x128xf32>, vector<128x128xf32>, vector<32x128xf32> -> vector<32x128xf32>
      %c0_36 = arith.constant 0 : index
      %c0_37 = arith.constant 0 : index
      %54 = vector.load %arg9[%c0_36, %c0_37] : memref<1x128xf32, #tpu.memory_space<vmem>>, vector<1x128xf32>
      %55 = vector.broadcast %54 : vector<1x128xf32> to vector<32x128xf32>
      %56 = arith.addf %53, %55 : vector<32x128xf32>
      %57 = vector.extract_strided_slice %46 {offsets = [0, 0], sizes = [32, 32], strides = [1, 1]} : vector<32x128xf32> to vector<32x32xf32>
      %c0_38 = arith.constant 0 : index
      %c0_39 = arith.constant 0 : index
      %c0_40 = arith.constant 0 : index
      %58 = vector.load %arg16[%c0_38, %c0_39, %c0_40] : memref<4x32x32xf32, #tpu.memory_space<vmem>>, vector<1x32x32xf32>
      %59 = vector.shape_cast %58 : vector<1x32x32xf32> to vector<32x32xf32>
      %60 = vector.shape_cast %57 : vector<32x32xf32> to vector<1x32x32xf32>
      tpu.vector_store %arg16[%c0_38, %c0_39, %c0_40], %60 {strides = array<i32>} : memref<4x32x32xf32, #tpu.memory_space<vmem>>, vector<1x32x32xf32>,
      %61 = vector.extract_strided_slice %51 {offsets = [0, 0], sizes = [32, 32], strides = [1, 1]} : vector<32x128xf32> to vector<32x32xf32>
      %c0_41 = arith.constant 0 : index
      %c0_42 = arith.constant 0 : index
      %c0_43 = arith.constant 0 : index
      %62 = vector.load %arg17[%c0_41, %c0_42, %c0_43] : memref<4x32x32xf32, #tpu.memory_space<vmem>>, vector<1x32x32xf32>
      %63 = vector.shape_cast %62 : vector<1x32x32xf32> to vector<32x32xf32>
      %64 = vector.shape_cast %61 : vector<32x32xf32> to vector<1x32x32xf32>
      tpu.vector_store %arg17[%c0_41, %c0_42, %c0_43], %64 {strides = array<i32>} : memref<4x32x32xf32, #tpu.memory_space<vmem>>, vector<1x32x32xf32>,
      %65 = vector.extract_strided_slice %56 {offsets = [0, 0], sizes = [32, 32], strides = [1, 1]} : vector<32x128xf32> to vector<32x32xf32>
      %c0_44 = arith.constant 0 : index
      %c0_45 = arith.constant 0 : index
      %c0_46 = arith.constant 0 : index
      %66 = vector.load %arg18[%c0_44, %c0_45, %c0_46] : memref<4x32x32xf32, #tpu.memory_space<vmem>>, vector<1x32x32xf32>
      %67 = vector.shape_cast %66 : vector<1x32x32xf32> to vector<32x32xf32>
      %68 = vector.shape_cast %65 : vector<32x32xf32> to vector<1x32x32xf32>
      tpu.vector_store %arg18[%c0_44, %c0_45, %c0_46], %68 {strides = array<i32>} : memref<4x32x32xf32, #tpu.memory_space<vmem>>, vector<1x32x32xf32>,
      %69 = vector.extract_strided_slice %46 {offsets = [0, 32], sizes = [32, 32], strides = [1, 1]} : vector<32x128xf32> to vector<32x32xf32>
      %c1 = arith.constant 1 : index
      %c0_47 = arith.constant 0 : index
      %c0_48 = arith.constant 0 : index
      %70 = vector.load %arg16[%c1, %c0_47, %c0_48] : memref<4x32x32xf32, #tpu.memory_space<vmem>>, vector<1x32x32xf32>
      %71 = vector.shape_cast %70 : vector<1x32x32xf32> to vector<32x32xf32>
      %72 = vector.shape_cast %69 : vector<32x32xf32> to vector<1x32x32xf32>
      tpu.vector_store %arg16[%c1, %c0_47, %c0_48], %72 {strides = array<i32>} : memref<4x32x32xf32, #tpu.memory_space<vmem>>, vector<1x32x32xf32>,
      %73 = vector.extract_strided_slice %51 {offsets = [0, 32], sizes = [32, 32], strides = [1, 1]} : vector<32x128xf32> to vector<32x32xf32>
      %c1_49 = arith.constant 1 : index
      %c0_50 = arith.constant 0 : index
      %c0_51 = arith.constant 0 : index
      %74 = vector.load %arg17[%c1_49, %c0_50, %c0_51] : memref<4x32x32xf32, #tpu.memory_space<vmem>>, vector<1x32x32xf32>
      %75 = vector.shape_cast %74 : vector<1x32x32xf32> to vector<32x32xf32>
      %76 = vector.shape_cast %73 : vector<32x32xf32> to vector<1x32x32xf32>
      tpu.vector_store %arg17[%c1_49, %c0_50, %c0_51], %76 {strides = array<i32>} : memref<4x32x32xf32, #tpu.memory_space<vmem>>, vector<1x32x32xf32>,
      %77 = vector.extract_strided_slice %56 {offsets = [0, 32], sizes = [32, 32], strides = [1, 1]} : vector<32x128xf32> to vector<32x32xf32>
      %c1_52 = arith.constant 1 : index
      %c0_53 = arith.constant 0 : index
      %c0_54 = arith.constant 0 : index
      %78 = vector.load %arg18[%c1_52, %c0_53, %c0_54] : memref<4x32x32xf32, #tpu.memory_space<vmem>>, vector<1x32x32xf32>
      %79 = vector.shape_cast %78 : vector<1x32x32xf32> to vector<32x32xf32>
      %80 = vector.shape_cast %77 : vector<32x32xf32> to vector<1x32x32xf32>
      tpu.vector_store %arg18[%c1_52, %c0_53, %c0_54], %80 {strides = array<i32>} : memref<4x32x32xf32, #tpu.memory_space<vmem>>, vector<1x32x32xf32>,
      %81 = vector.extract_strided_slice %46 {offsets = [0, 64], sizes = [32, 32], strides = [1, 1]} : vector<32x128xf32> to vector<32x32xf32>
      %c2 = arith.constant 2 : index
      %c0_55 = arith.constant 0 : index
      %c0_56 = arith.constant 0 : index
      %82 = vector.load %arg16[%c2, %c0_55, %c0_56] : memref<4x32x32xf32, #tpu.memory_space<vmem>>, vector<1x32x32xf32>
      %83 = vector.shape_cast %82 : vector<1x32x32xf32> to vector<32x32xf32>
      %84 = vector.shape_cast %81 : vector<32x32xf32> to vector<1x32x32xf32>
      tpu.vector_store %arg16[%c2, %c0_55, %c0_56], %84 {strides = array<i32>} : memref<4x32x32xf32, #tpu.memory_space<vmem>>, vector<1x32x32xf32>,
      %85 = vector.extract_strided_slice %51 {offsets = [0, 64], sizes = [32, 32], strides = [1, 1]} : vector<32x128xf32> to vector<32x32xf32>
      %c2_57 = arith.constant 2 : index
      %c0_58 = arith.constant 0 : index
      %c0_59 = arith.constant 0 : index
      %86 = vector.load %arg17[%c2_57, %c0_58, %c0_59] : memref<4x32x32xf32, #tpu.memory_space<vmem>>, vector<1x32x32xf32>
      %87 = vector.shape_cast %86 : vector<1x32x32xf32> to vector<32x32xf32>
      %88 = vector.shape_cast %85 : vector<32x32xf32> to vector<1x32x32xf32>
      tpu.vector_store %arg17[%c2_57, %c0_58, %c0_59], %88 {strides = array<i32>} : memref<4x32x32xf32, #tpu.memory_space<vmem>>, vector<1x32x32xf32>,
      %89 = vector.extract_strided_slice %56 {offsets = [0, 64], sizes = [32, 32], strides = [1, 1]} : vector<32x128xf32> to vector<32x32xf32>
      %c2_60 = arith.constant 2 : index
      %c0_61 = arith.constant 0 : index
      %c0_62 = arith.constant 0 : index
      %90 = vector.load %arg18[%c2_60, %c0_61, %c0_62] : memref<4x32x32xf32, #tpu.memory_space<vmem>>, vector<1x32x32xf32>
      %91 = vector.shape_cast %90 : vector<1x32x32xf32> to vector<32x32xf32>
      %92 = vector.shape_cast %89 : vector<32x32xf32> to vector<1x32x32xf32>
      tpu.vector_store %arg18[%c2_60, %c0_61, %c0_62], %92 {strides = array<i32>} : memref<4x32x32xf32, #tpu.memory_space<vmem>>, vector<1x32x32xf32>,
      %93 = vector.extract_strided_slice %46 {offsets = [0, 96], sizes = [32, 32], strides = [1, 1]} : vector<32x128xf32> to vector<32x32xf32>
      %c3 = arith.constant 3 : index
      %c0_63 = arith.constant 0 : index
      %c0_64 = arith.constant 0 : index
      %94 = vector.load %arg16[%c3, %c0_63, %c0_64] : memref<4x32x32xf32, #tpu.memory_space<vmem>>, vector<1x32x32xf32>
      %95 = vector.shape_cast %94 : vector<1x32x32xf32> to vector<32x32xf32>
      %96 = vector.shape_cast %93 : vector<32x32xf32> to vector<1x32x32xf32>
      tpu.vector_store %arg16[%c3, %c0_63, %c0_64], %96 {strides = array<i32>} : memref<4x32x32xf32, #tpu.memory_space<vmem>>, vector<1x32x32xf32>,
      %97 = vector.extract_strided_slice %51 {offsets = [0, 96], sizes = [32, 32], strides = [1, 1]} : vector<32x128xf32> to vector<32x32xf32>
      %c3_65 = arith.constant 3 : index
      %c0_66 = arith.constant 0 : index
      %c0_67 = arith.constant 0 : index
      %98 = vector.load %arg17[%c3_65, %c0_66, %c0_67] : memref<4x32x32xf32, #tpu.memory_space<vmem>>, vector<1x32x32xf32>
      %99 = vector.shape_cast %98 : vector<1x32x32xf32> to vector<32x32xf32>
      %100 = vector.shape_cast %97 : vector<32x32xf32> to vector<1x32x32xf32>
      tpu.vector_store %arg17[%c3_65, %c0_66, %c0_67], %100 {strides = array<i32>} : memref<4x32x32xf32, #tpu.memory_space<vmem>>, vector<1x32x32xf32>,
      %101 = vector.extract_strided_slice %56 {offsets = [0, 96], sizes = [32, 32], strides = [1, 1]} : vector<32x128xf32> to vector<32x32xf32>
      %c3_68 = arith.constant 3 : index
      %c0_69 = arith.constant 0 : index
      %c0_70 = arith.constant 0 : index
      %102 = vector.load %arg18[%c3_68, %c0_69, %c0_70] : memref<4x32x32xf32, #tpu.memory_space<vmem>>, vector<1x32x32xf32>
      %103 = vector.shape_cast %102 : vector<1x32x32xf32> to vector<32x32xf32>
      %104 = vector.shape_cast %101 : vector<32x32xf32> to vector<1x32x32xf32>
      tpu.vector_store %arg18[%c3_68, %c0_69, %c0_70], %104 {strides = array<i32>} : memref<4x32x32xf32, #tpu.memory_space<vmem>>, vector<1x32x32xf32>,
    } else {
    }
    %3 = arith.index_cast %arg1 : i32 to index
    %c0 = arith.constant 0 : index
    %c0_1 = arith.constant 0 : index
    %4 = vector.load %arg16[%3, %c0, %c0_1] : memref<4x32x32xf32, #tpu.memory_space<vmem>>, vector<1x32x32xf32>
    %5 = vector.shape_cast %4 : vector<1x32x32xf32> to vector<32x32xf32>
    %6 = arith.index_cast %arg1 : i32 to index
    %c0_2 = arith.constant 0 : index
    %c0_3 = arith.constant 0 : index
    %7 = vector.load %arg17[%6, %c0_2, %c0_3] : memref<4x32x32xf32, #tpu.memory_space<vmem>>, vector<1x32x32xf32>
    %8 = vector.shape_cast %7 : vector<1x32x32xf32> to vector<32x32xf32>
    %9 = arith.index_cast %arg1 : i32 to index
    %c0_4 = arith.constant 0 : index
    %c0_5 = arith.constant 0 : index
    %10 = vector.load %arg18[%9, %c0_4, %c0_5] : memref<4x32x32xf32, #tpu.memory_space<vmem>>, vector<1x32x32xf32>
    %11 = vector.shape_cast %10 : vector<1x32x32xf32> to vector<32x32xf32>
    %cst = arith.constant dense<0.000000e+00> : vector<32x32xf32>
    %12 = tpu.matmul %5, %8, %cst {dimension_numbers = #tpu.dot_dimension_numbers<[1], [1], [0], [0], [0, 0, 1, 0], [], []>} : vector<32x32xf32>, vector<32x32xf32>, vector<32x32xf32> -> vector<32x32xf32>
    %cst_6 = arith.constant 0.176776692 : f32
    %13 = vector.broadcast %cst_6 : f32 to vector<32x32xf32>
    %14 = arith.mulf %12, %13 : vector<32x32xf32>
    %c0_7 = arith.constant 0 : index
    %c0_8 = arith.constant 0 : index
    %c0_9 = arith.constant 0 : index
    %15 = vector.load %arg3[%c0_7, %c0_8, %c0_9] : memref<1x1x32xf32, #tpu.memory_space<vmem>>, vector<1x1x32xf32>
    %16 = vector.shape_cast %15 : vector<1x1x32xf32> to vector<1x32xf32>
    %17 = vector.broadcast %16 : vector<1x32xf32> to vector<32x32xf32>
    %18 = arith.addf %14, %17 : vector<32x32xf32>
    %cst_10 = arith.constant dense<0xFF800000> : vector<32xf32>
    %19 = vector.multi_reduction <maximumf>, %18, %cst_10 [1] : vector<32x32xf32> to vector<32xf32>
    %20 = vector.shape_cast %19 : vector<32xf32> to vector<32x1xf32>
    %21 = vector.broadcast %20 : vector<32x1xf32> to vector<32x32xf32>
    %22 = arith.subf %18, %21 : vector<32x32xf32>
    %23 = math.exp %22 : vector<32x32xf32>
    %cst_11 = arith.constant dense<0.000000e+00> : vector<32xf32>
    %24 = vector.multi_reduction <add>, %23, %cst_11 [1] : vector<32x32xf32> to vector<32xf32>
    %25 = vector.shape_cast %24 : vector<32xf32> to vector<32x1xf32>
    %26 = tpu.reciprocal %25 {approx = true} : vector<32x1xf32> -> vector<32x1xf32>
    %27 = vector.broadcast %26 : vector<32x1xf32> to vector<32x32xf32>
    %28 = arith.mulf %23, %27 : vector<32x32xf32>
    %c0_12 = arith.constant 0 : index
    %c0_13 = arith.constant 0 : index
    %c0_14 = arith.constant 0 : index
    %c0_15 = arith.constant 0 : index
    %29 = vector.load %arg15[%c0_12, %c0_13, %c0_14, %c0_15] : memref<1x1x32x32xf32, #tpu.memory_space<vmem>>, vector<1x1x32x32xf32>
    %30 = vector.shape_cast %29 : vector<1x1x32x32xf32> to vector<32x32xf32>
    %31 = vector.shape_cast %28 : vector<32x32xf32> to vector<1x1x32x32xf32>
    tpu.vector_store %arg15[%c0_12, %c0_13, %c0_14, %c0_15], %31 {strides = array<i32>} : memref<1x1x32x32xf32, #tpu.memory_space<vmem>>, vector<1x1x32x32xf32>,
    %cst_16 = arith.constant dense<0.000000e+00> : vector<32x32xf32>
    %32 = tpu.matmul %28, %11, %cst_16 {dimension_numbers = #tpu.dot_dimension_numbers<[1], [0], [0], [1], [0, 0, 1, 1], [], []>} : vector<32x32xf32>, vector<32x32xf32>, vector<32x32xf32> -> vector<32x32xf32>
    %33 = arith.index_cast %arg1 : i32 to index
    %c0_17 = arith.constant 0 : index
    %c0_18 = arith.constant 0 : index
    %34 = vector.load %arg19[%33, %c0_17, %c0_18] : memref<4x32x32xf32, #tpu.memory_space<vmem>>, vector<1x32x32xf32>
    %35 = vector.shape_cast %34 : vector<1x32x32xf32> to vector<32x32xf32>
    %36 = vector.shape_cast %32 : vector<32x32xf32> to vector<1x32x32xf32>
    tpu.vector_store %arg19[%33, %c0_17, %c0_18], %36 {strides = array<i32>} : memref<4x32x32xf32, #tpu.memory_space<vmem>>, vector<1x32x32xf32>,
    %c3_i32 = arith.constant 3 : i32
    %37 = arith.cmpi eq, %arg1, %c3_i32 : i32
    %38 = arith.extui %37 : i1 to i32
    %c0_i32_19 = arith.constant 0 : i32
    %39 = arith.cmpi ne, %38, %c0_i32_19 : i32
    scf.if %39 {
      %c0_20 = arith.constant 0 : index
      %c0_21 = arith.constant 0 : index
      %c0_22 = arith.constant 0 : index
      %40 = vector.load %arg19[%c0_20, %c0_21, %c0_22] : memref<4x32x32xf32, #tpu.memory_space<vmem>>, vector<1x32x32xf32>
      %41 = vector.shape_cast %40 : vector<1x32x32xf32> to vector<32x32xf32>
      %c1 = arith.constant 1 : index
      %c0_23 = arith.constant 0 : index
      %c0_24 = arith.constant 0 : index
      %42 = vector.load %arg19[%c1, %c0_23, %c0_24] : memref<4x32x32xf32, #tpu.memory_space<vmem>>, vector<1x32x32xf32>
      %43 = vector.shape_cast %42 : vector<1x32x32xf32> to vector<32x32xf32>
      %c2 = arith.constant 2 : index
      %c0_25 = arith.constant 0 : index
      %c0_26 = arith.constant 0 : index
      %44 = vector.load %arg19[%c2, %c0_25, %c0_26] : memref<4x32x32xf32, #tpu.memory_space<vmem>>, vector<1x32x32xf32>
      %45 = vector.shape_cast %44 : vector<1x32x32xf32> to vector<32x32xf32>
      %c3 = arith.constant 3 : index
      %c0_27 = arith.constant 0 : index
      %c0_28 = arith.constant 0 : index
      %46 = vector.load %arg19[%c3, %c0_27, %c0_28] : memref<4x32x32xf32, #tpu.memory_space<vmem>>, vector<1x32x32xf32>
      %47 = vector.shape_cast %46 : vector<1x32x32xf32> to vector<32x32xf32>
      %48 = tpu.concatenate %41, %43, %45, %47 in 1 : vector<32x32xf32>, vector<32x32xf32>, vector<32x32xf32>, vector<32x32xf32> -> vector<32x128xf32>
      %c0_29 = arith.constant 0 : index
      %c0_30 = arith.constant 0 : index
      %49 = vector.load %arg10[%c0_29, %c0_30] : memref<128x128xf32, #tpu.memory_space<vmem>>, vector<128x128xf32>
      %cst_31 = arith.constant dense<0.000000e+00> : vector<32x128xf32>
      %50 = tpu.matmul %48, %49, %cst_31 {dimension_numbers = #tpu.dot_dimension_numbers<[1], [1], [0], [0], [0, 0, 1, 0], [], []>} : vector<32x128xf32>, vector<128x128xf32>, vector<32x128xf32> -> vector<32x128xf32>
      %c0_32 = arith.constant 0 : index
      %c0_33 = arith.constant 0 : index
      %51 = vector.load %arg11[%c0_32, %c0_33] : memref<1x128xf32, #tpu.memory_space<vmem>>, vector<1x128xf32>
      %52 = vector.broadcast %51 : vector<1x128xf32> to vector<32x128xf32>
      %53 = arith.addf %50, %52 : vector<32x128xf32>
      %c0_34 = arith.constant 0 : index
      %c0_35 = arith.constant 0 : index
      %c0_36 = arith.constant 0 : index
      %54 = vector.load %arg2[%c0_34, %c0_35, %c0_36] : memref<1x32x128xf32, #tpu.memory_space<vmem>>, vector<1x32x128xf32>
      %55 = vector.shape_cast %54 : vector<1x32x128xf32> to vector<32x128xf32>
      %56 = arith.addf %53, %55 : vector<32x128xf32>
      %cst_37 = arith.constant dense<0.000000e+00> : vector<32xf32>
      %57 = vector.multi_reduction <add>, %56, %cst_37 [1] : vector<32x128xf32> to vector<32xf32>
      %58 = vector.shape_cast %57 : vector<32xf32> to vector<32x1xf32>
      %cst_38 = arith.constant 1.280000e+02 : f32
      %59 = vector.broadcast %cst_38 : f32 to vector<32x1xf32>
      %60 = arith.divf %58, %59 : vector<32x1xf32>
      %61 = vector.broadcast %60 : vector<32x1xf32> to vector<32x128xf32>
      %62 = arith.subf %56, %61 : vector<32x128xf32>
      %63 = arith.mulf %62, %62 : vector<32x128xf32>
      %cst_39 = arith.constant dense<0.000000e+00> : vector<32xf32>
      %64 = vector.multi_reduction <add>, %63, %cst_39 [1] : vector<32x128xf32> to vector<32xf32>
      %65 = vector.shape_cast %64 : vector<32xf32> to vector<32x1xf32>
      %cst_40 = arith.constant 1.280000e+02 : f32
      %66 = vector.broadcast %cst_40 : f32 to vector<32x1xf32>
      %67 = arith.divf %65, %66 : vector<32x1xf32>
      %68 = vector.broadcast %60 : vector<32x1xf32> to vector<32x128xf32>
      %69 = arith.subf %56, %68 : vector<32x128xf32>
      %cst_41 = arith.constant 9.99999996E-13 : f32
      %70 = vector.broadcast %cst_41 : f32 to vector<32x1xf32>
      %71 = arith.addf %67, %70 : vector<32x1xf32>
      %72 = math.rsqrt %71 : vector<32x1xf32>
      %73 = vector.broadcast %72 : vector<32x1xf32> to vector<32x128xf32>
      %74 = arith.mulf %69, %73 : vector<32x128xf32>
      %c0_42 = arith.constant 0 : index
      %c0_43 = arith.constant 0 : index
      %75 = vector.load %arg12[%c0_42, %c0_43] : memref<1x128xf32, #tpu.memory_space<vmem>>, vector<1x128xf32>
      %76 = vector.broadcast %75 : vector<1x128xf32> to vector<32x128xf32>
      %77 = arith.mulf %76, %74 : vector<32x128xf32>
      %c0_44 = arith.constant 0 : index
      %c0_45 = arith.constant 0 : index
      %78 = vector.load %arg13[%c0_44, %c0_45] : memref<1x128xf32, #tpu.memory_space<vmem>>, vector<1x128xf32>
      %79 = vector.broadcast %78 : vector<1x128xf32> to vector<32x128xf32>
      %80 = arith.addf %77, %79 : vector<32x128xf32>
      %c0_46 = arith.constant 0 : index
      %c0_47 = arith.constant 0 : index
      %c0_48 = arith.constant 0 : index
      %81 = vector.load %arg14[%c0_46, %c0_47, %c0_48] : memref<1x32x128xf32, #tpu.memory_space<vmem>>, vector<1x32x128xf32>
      %82 = vector.shape_cast %81 : vector<1x32x128xf32> to vector<32x128xf32>
      %83 = vector.shape_cast %80 : vector<32x128xf32> to vector<1x32x128xf32>
      tpu.vector_store %arg14[%c0_46, %c0_47, %c0_48], %83 {strides = array<i32>} : memref<1x32x128xf32, #tpu.memory_space<vmem>>, vector<1x32x128xf32>,
    } else {
    }
    return
  }
  func.func @transform_0(%arg0: i32, %arg1: i32) -> (i32, i32, i32) {
    %c0_i32 = arith.constant 0 : i32
    %c0_i32_0 = arith.constant 0 : i32
    %c0_i32_1 = arith.constant 0 : i32
    return %arg0, %c0_i32, %c0_i32_0 : i32, i32, i32
  }
  func.func @transform_1(%arg0: i32, %arg1: i32) -> (i32, i32, i32) {
    %c0_i32 = arith.constant 0 : i32
    %c0_i32_0 = arith.constant 0 : i32
    %c0_i32_1 = arith.constant 0 : i32
    return %arg0, %c0_i32, %c0_i32_0 : i32, i32, i32
  }
  func.func @transform_2(%arg0: i32, %arg1: i32) -> (i32, i32) {
    %c0_i32 = arith.constant 0 : i32
    %c0_i32_0 = arith.constant 0 : i32
    %c0_i32_1 = arith.constant 0 : i32
    return %c0_i32, %c0_i32_0 : i32, i32
  }
  func.func @transform_3(%arg0: i32, %arg1: i32) -> (i32, i32) {
    %c0_i32 = arith.constant 0 : i32
    %c0_i32_0 = arith.constant 0 : i32
    %c0_i32_1 = arith.constant 0 : i32
    return %c0_i32, %c0_i32_0 : i32, i32
  }
  func.func @transform_4(%arg0: i32, %arg1: i32) -> (i32, i32) {
    %c0_i32 = arith.constant 0 : i32
    %c0_i32_0 = arith.constant 0 : i32
    %c0_i32_1 = arith.constant 0 : i32
    return %c0_i32, %c0_i32_0 : i32, i32
  }
  func.func @transform_5(%arg0: i32, %arg1: i32) -> (i32, i32) {
    %c0_i32 = arith.constant 0 : i32
    %c0_i32_0 = arith.constant 0 : i32
    %c0_i32_1 = arith.constant 0 : i32
    return %c0_i32, %c0_i32_0 : i32, i32
  }
  func.func @transform_6(%arg0: i32, %arg1: i32) -> (i32, i32) {
    %c0_i32 = arith.constant 0 : i32
    %c0_i32_0 = arith.constant 0 : i32
    %c0_i32_1 = arith.constant 0 : i32
    return %c0_i32, %c0_i32_0 : i32, i32
  }
  func.func @transform_7(%arg0: i32, %arg1: i32) -> (i32, i32) {
    %c0_i32 = arith.constant 0 : i32
    %c0_i32_0 = arith.constant 0 : i32
    %c0_i32_1 = arith.constant 0 : i32
    return %c0_i32, %c0_i32_0 : i32, i32
  }
  func.func @transform_8(%arg0: i32, %arg1: i32) -> (i32, i32) {
    %c0_i32 = arith.constant 0 : i32
    %c0_i32_0 = arith.constant 0 : i32
    %c0_i32_1 = arith.constant 0 : i32
    return %c0_i32, %c0_i32_0 : i32, i32
  }
  func.func @transform_9(%arg0: i32, %arg1: i32) -> (i32, i32) {
    %c0_i32 = arith.constant 0 : i32
    %c0_i32_0 = arith.constant 0 : i32
    %c0_i32_1 = arith.constant 0 : i32
    return %c0_i32, %c0_i32_0 : i32, i32
  }
  func.func @transform_10(%arg0: i32, %arg1: i32) -> (i32, i32) {
    %c0_i32 = arith.constant 0 : i32
    %c0_i32_0 = arith.constant 0 : i32
    %c0_i32_1 = arith.constant 0 : i32
    return %c0_i32, %c0_i32_0 : i32, i32
  }
  func.func @transform_11(%arg0: i32, %arg1: i32) -> (i32, i32) {
    %c0_i32 = arith.constant 0 : i32
    %c0_i32_0 = arith.constant 0 : i32
    %c0_i32_1 = arith.constant 0 : i32
    return %c0_i32, %c0_i32_0 : i32, i32
  }
  func.func @transform_12(%arg0: i32, %arg1: i32) -> (i32, i32, i32) {
    %c0_i32 = arith.constant 0 : i32
    %c0_i32_0 = arith.constant 0 : i32
    %c0_i32_1 = arith.constant 0 : i32
    return %arg0, %c0_i32, %c0_i32_0 : i32, i32, i32
  }
  func.func @transform_13(%arg0: i32, %arg1: i32) -> (i32, i32, i32, i32) {
    %c0_i32 = arith.constant 0 : i32
    %c0_i32_0 = arith.constant 0 : i32
    %c0_i32_1 = arith.constant 0 : i32
    return %arg0, %arg1, %c0_i32, %c0_i32_0 : i32, i32, i32, i32
  }
}

</mosaic_0001>

<bundles_post_ra>
// kernel: tpu_custom_call.1
= control target key start
LH: loop header
LB: loop body
LE: loop exit
PB: predicated region body
PF: predicated region fallthrough
CT: control target
= control target key end

     0   :  { %s3449_s0 = inlined_call_operand.hbm [shape: f32[2,32,128], index: 0, kind: input, shape index: {}]   ;;  %s3450_s1 = inlined_call_operand.hbm [shape: f32[2,1,32], index: 1, kind: input, shape index: {}]   ;;  %s3451_s2 = inlined_call_operand.hbm [shape: f32[128,128], index: 2, kind: input, shape index: {}]   ;;  %s3452_s3 = inlined_call_operand.vmem [shape: f32[1,128], index: 3, kind: input, shape index: {}]   ;;  %s3453_s4 = inlined_call_operand.hbm [shape: f32[128,128], index: 4, kind: input, shape index: {}]   ;;  %s3454_s5 = inlined_call_operand.vmem [shape: f32[1,128], index: 5, kind: input, shape index: {}]   ;;  %s3455_s6 = inlined_call_operand.hbm [shape: f32[128,128], index: 6, kind: input, shape index: {}]   ;;  %s3456_s7 = inlined_call_operand.vmem [shape: f32[1,128], index: 7, kind: input, shape index: {}]   ;;  %s3457_s8 = inlined_call_operand.hbm [shape: f32[128,128], index: 8, kind: input, shape index: {}]   ;;  %s3458_s9 = inlined_call_operand.vmem [shape: f32[1,128], index: 9, kind: input, shape index: {}]   ;;  %s3459_s10 = inlined_call_operand.vmem [shape: f32[1,128], index: 10, kind: input, shape index: {}]   ;;  %s3460_s11 = inlined_call_operand.vmem [shape: f32[1,128], index: 11, kind: input, shape index: {}]   ;;  %s3461_s12 = inlined_call_operand.hbm [shape: f32[2,32,128], index: 12, kind: output, shape index: {0}]   ;;  %s3462_s13 = inlined_call_operand.hbm [shape: f32[2,4,32,32], index: 13, kind: output, shape index: {1}]  }
   0x1   :  { %3482 = sst [smem:[#allocation39_spill]] %s3449_s0 }
   0x2   :  { %3483 = sst [smem:[#allocation40_spill]] %s3451_s2 }
   0x3   :  { %3484 = sst [smem:[#allocation41_spill]] %s3453_s4 }
   0x4   :  { %3485 = sst [smem:[#allocation42_spill]] %s3454_s5 }
   0x5   :  { %3486 = sst [smem:[#allocation43_spill]] %s3455_s6 }
   0x6   :  { %3487 = sst [smem:[#allocation44_spill]] %s3456_s7 }
   0x7   :  { %3488 = sst [smem:[#allocation45_spill]] %s3457_s8 }
   0x8   :  { %3489 = sst [smem:[#allocation46_spill]] %s3458_s9 }
   0x9   :  { %3490 = sst [smem:[#allocation47_spill]] %s3459_s10 }
   0xa   :  { %3491 = sst [smem:[#allocation48_spill]] %s3460_s11 }
   0xb   :  { %3492 = sst [smem:[#allocation49_spill]] %s3461_s12 }
   0xc   :  { %3493 = sst [smem:[#allocation50_spill]] %s3462_s13 }
   0xd   :  { %19 = vsyncpa [#allocation7], 0 }
   0xe   :  { %21 = vsyncpa [#allocation7 + $0x1], 0 }
   0xf   :  { %22 = vsyncpa [#allocation10], 0 }
  0x10   :  { %24 = vsyncpa [#allocation10 + $0x1], 0 }
  0x11   :  { %25 = vsyncpa [#allocation13], 0 }
  0x12   :  { %26 = vsyncpa [#allocation16], 0 }
  0x13   :  { %27 = vsyncpa [#allocation8], 0 }
  0x14   :  { %29 = vsyncpa [#allocation8 + $0x1], 0 }
  0x15   :  { %30 = vsyncpa [#allocation19], 0 }
  0x16   :  { %32 = vsyncpa [#allocation19 + $0x1], 0  ;;  %s2897_s25 = smov 0   ;;  %s2899_s26 = smov 0  }
  0x17   :  { %s2901_s27 = smov 0   ;;  %s2903_s28 = smov 0  }
  0x18   :  { %s2905_s29 = smov 0   ;;  %s2907_s30 = smov 0  }
  0x19   :  { %s2909_s14 = smov 0   ;;  %s2911_s15 = smov 0  }
  0x1a   :  { %s2913_s16 = smov 0   ;;  %s2915_s17 = smov 0  }
  0x1b   :  { %s2917_s18 = smov 0  }
  0x1c LB: > { %3494 = sst [smem:[#allocation27_spill]] %s2767_s25  ;;  %s2953_s19 = sadd.s32 4294967295, %s2807_s18   ;;  %s2807_s18 = sphi %s2917_s18, %s38_s18   ;;  %s2803_s17 = sphi %s2915_s17, %s3557_s17   ;;  %s2799_s16 = sphi %s2913_s16, %s3549_s16   ;;  %s2795_s15 = sphi %s2911_s15, %s3556_s15   ;;  %s2791_s14 = sphi %s2909_s14, %s3548_s14   ;;  %s2787_s30 = sphi %s2907_s30, %s3547_s30   ;;  %s2783_s29 = sphi %s2905_s29, %s3555_s29   ;;  %s2779_s28 = sphi %s2903_s28, %s3554_s28   ;;  %s2775_s27 = sphi %s2901_s27, %s3553_s27   ;;  %s2771_s26 = sphi %s2899_s26, %s3552_s26   ;;  %s2767_s25 = sphi %s2897_s25, %s3551_s25  }
  0x1d   : > { %3495 = sst [smem:[#allocation28_spill]] %s2779_s28  ;;  %s1872_s20 = sadd.s32 4294967294, %s2807_s18  }
  0x1e   : > { %3496 = sst [smem:[#allocation29_spill]] %s2787_s30  ;;  %p70_p0 = scmp.ne.s32.totalorder %s2783_s29, %s2779_s28 }
  0x1f   : > { %3497 = sst [smem:[#allocation30_spill]] %s2795_s15  ;;  %p3473_p1 = scmp.eq.s32.totalorder %s2953_s19, 0 }
  0x20   : > { %3498 = sst [smem:[#allocation31_spill]] %s2799_s16  ;;  %p3470_p2 = scmp.eq.s32.totalorder %s2953_s19, 7 }
  0x21   : > { %p336_p3 = scmp.eq.s32.totalorder %s1872_s20, 7  ;;  %p2962_p4 = por %p3473_p1, %p70_p0 }
  0x22   : > { %p357_p6 = scmp.ne.s32.totalorder %s2775_s27, %s2771_s26  ;;  %p363_p7 = scmp.ne.s32.totalorder %s2771_s26, %s2767_s25 }
  0x23   : > { %p2967_p5 = por %p336_p3, %p70_p0  ;;  %p1873_p8 = scmp.ge.s32.totalorder %s2807_s18, 1 }
  0x24   : > { %p2978_p9 = por %p357_p6, %p3470_p2  ;;  %p371_p10 = scmp.lt.s32.totalorder %s2807_s18, 9 }
  0x25   : > { %s3500_s23 = scalar_select %p2967_p5, 1, 0 }
  0x26   : > { %s3502_s24 = scalar_select %p2978_p9, 1, 0 }
  0x27   : > { %3501 = sst [smem:[#allocation32_spill]] %s3500_s23  ;;  %p2983_p11 = por %p363_p7, %p336_p3 }
  0x28   : > { %3503 = sst [smem:[#allocation33_spill]] %s3502_s24  ;;  %p2987_p12 = pnand %p1873_p8, %p371_p10 }
  0x29   : > { %s3504_s20 = scalar_select %p2983_p11, 1, 0 }
  0x2a   : > { %s2809_s22 = smov [#allocation11]   ;;  %p2288_p13 = pneg %p2987_p12 }
  0x2b   : > { %3505 = sst [smem:[#allocation34_spill]] %s3504_s20  ;;  %s383_s23 = sshll.u32 %s2809_s22, 4  ;;  %s384_s23 = int_to_ptr.vmem [resolvable:$true] %s383_s23 }
  0x2c   : > { %p2995_p0 = pnand %p2288_p13, %p3473_p1  ;;  %s2810_s13 = smov [#allocation12]  }
  0x2d   : > { %s399_s24 = sshll.u32 %s2810_s13, 4  ;;  %s2492_s20 = scalar_lea.vmem %s384_s23, 2048  ;;  %s400_s24 = int_to_ptr.vmem [resolvable:$true] %s399_s24 }
  0x2e   : > { %p2483_p3 = pneg %p2995_p0  ;;  %p2493_p6 = scmp.ne.s32.totalorder %s384_s23, %s2492_s20 }
  0x2f   : > { %p2500_p10 = scmp.lt.s32.totalorder %s384_s23, %s384_s23  ;;  %p2501_p2 = scmp.lt.s32.totalorder %s2492_s20, %s2492_s20 }
  0x30   : > { %p2495_p7 = pnand %p2493_p6, %p2483_p3 }
  0x31   : > { %p2502_p11 = por %p2501_p2, %p2500_p10 }
  0x32   : > { %p2496_p8 = pneg %p2495_p7 }
  0x34   : > { %p2503_p13 = pnand %p2502_p11, %p2496_p8 }
  0x36   : > { %2506 = shalt.err (!%p2503_p13)
}
  0x37   : > { %s3474_s22 = smov 128   ;;  %s3475_s12 = smov 8  }
  0x38   : > { %s3508_s2 = sld [smem:[#allocation40_spill]]  ;;  %s2518_s11 = scalar_lea.vmem %s400_s24, 2048 }
  0x39   : > { %p2519_p6 = scmp.ne.s32.totalorder %s400_s24, %s2518_s11  ;;  %p2526_p11 = scmp.lt.s32.totalorder %s400_s24, %s400_s24 }
  0x3a   : > { %p2527_p8 = scmp.lt.s32.totalorder %s2518_s11, %s2518_s11 }
  0x3b   : > { %p2521_p7 = pnand %p2519_p6, %p2483_p3 }
  0x3c   : > { %p2528_p10 = por %p2527_p8, %p2526_p11 }
  0x3d   : > { %p2522_p2 = pneg %p2521_p7 }
  0x3e   : > { %2291 = dma.hbm_to_vmem [thread:$0]  (!%p2995_p0), %s3508_s2, 2048, %s384_s23, [#allocation10], %s3474_s22, %s3474_s22, %s3475_s12  }
  0x3f   : > { %p2529_p13 = pnand %p2528_p10, %p2522_p2 }
  0x41   : > { %2532 = shalt.err (!%p2529_p13)
}
  0x42   : > { %s3509_s4 = sld [smem:[#allocation41_spill]]  ;;  %s2813_s15 = smov [#allocation14]  }
  0x43   : > { %s415_s23 = sshll.u32 %s2813_s15, 4  ;;  %s2814_s13 = smov [#allocation15]   ;;  %s416_s23 = int_to_ptr.vmem [resolvable:$true] %s415_s23 }
  0x44   : > { %s431_s2 = sshll.u32 %s2814_s13, 4  ;;  %s2544_s9 = scalar_lea.vmem %s416_s23, 2048  ;;  %s432_s2 = int_to_ptr.vmem [resolvable:$true] %s431_s2 }
  0x45   : > { %p2545_p6 = scmp.ne.s32.totalorder %s416_s23, %s2544_s9  ;;  %p2552_p11 = scmp.lt.s32.totalorder %s416_s23, %s416_s23 }
  0x46   : > { %p2553_p8 = scmp.lt.s32.totalorder %s2544_s9, %s2544_s9 }
  0x47   : > { %p2547_p7 = pnand %p2545_p6, %p2483_p3 }
  0x48   : > { %2294 = dma.hbm_to_vmem [thread:$0]  (!%p2995_p0), %s3509_s4, 2048, %s400_s24, [#allocation13], %s3474_s22, %s3474_s22, %s3475_s12  }
  0x49   : > { %p2548_p2 = pneg %p2547_p7  ;;  %p2554_p10 = por %p2553_p8, %p2552_p11 }
  0x4b   : > { %p2555_p13 = pnand %p2554_p10, %p2548_p2 }
  0x4d   : > { %2558 = shalt.err (!%p2555_p13)
}
  0x4e   : > { %s3510_s6 = sld [smem:[#allocation43_spill]]  ;;  %s2570_s24 = scalar_lea.vmem %s432_s2, 2048 }
  0x4f   : > { %p2571_p1 = scmp.ne.s32.totalorder %s432_s2, %s2570_s24  ;;  %p2578_p11 = scmp.lt.s32.totalorder %s432_s2, %s432_s2 }
  0x50   : > { %p2579_p2 = scmp.lt.s32.totalorder %s2570_s24, %s2570_s24 }
  0x51   : > { %p2573_p6 = pnand %p2571_p1, %p2483_p3 }
  0x52   : > { %p2580_p8 = por %p2579_p2, %p2578_p11 }
  0x53   : > { %p2574_p7 = pneg %p2573_p6 }
  0x54   : > { %2297 = dma.hbm_to_vmem [thread:$0]  (!%p2995_p0), %s3510_s6, 2048, %s416_s23, [#allocation13], %s3474_s22, %s3474_s22, %s3475_s12  }
  0x55   : > { %p2581_p10 = pnand %p2580_p8, %p2574_p7 }
  0x57   : > { %2584 = shalt.err (!%p2581_p10)
}
  0x58   : > { %s3511_s8 = sld [smem:[#allocation45_spill]]  ;;  %s47_s25 = sadd.s32 1, %s2799_s16 }
  0x59   : > { %p48_p1 = scmp.ge.s32.totalorder %s47_s25, 4  ;;  %s50_s15 = sadd.s32 1, %s2803_s17 }
  0x5a   : > { %s57_s23 = sadd.s32 1, %s2787_s30  ;;  %p64_p3 = scmp.ne.s32.totalorder %s2787_s30, %s2783_s29 }
  0x5b   : > { %s3559_s25 = smov (%p48_p1, %s47_s25), 0  ;;  %s3561_s15 = smov (!%p48_p1, %s50_s15), %s2803_s17 }
  0x5c   : > { %3512 = sst [smem:[#allocation35_spill]] %s3559_s25  ;;  %p65_p13 = scmp.eq.s32.totalorder %s2807_s18, 0 }
  0x5d   : > { %p3513_p6 = scmp.eq.s32.totalorder %s2953_s19, 7  ;;  %p2319_p2 = scmp.lt.s32.totalorder %s2807_s18, 8 }
  0x5e   : > { %2300 = dma.hbm_to_vmem [thread:$0]  (!%p2995_p0), %s3511_s8, 2048, %s432_s2, [#allocation16], %s3474_s22, %s3474_s22, %s3475_s12  }
  0x5f   : > { %p3056_p7 = por %p3513_p6, %p64_p3  ;;  %p52_p0 = scmp.ge.s32.totalorder %s3561_s15, 2 }
  0x60   : > { %s343_s2 = ssub.s32 %s2799_s16, %s3559_s25  ;;  %p3062_p11 = por %p65_p13, %p64_p3 }
  0x61   : > { %s3514_s13 = scalar_select %p3056_p7, 1, 0 }
  0x62   : > { %s3563_s15 = smov (%p52_p0, %s3561_s15), 0  ;;  %s3070_s11 = sand.u32 1, %s2787_s30  }
  0x63   : > { %3515 = sst [smem:[#allocation36_spill]] %s3514_s13  ;;  %s1922_s24 = sshll.u32 %s2803_s17, 9 }
  0x64   : > { %3517 = sst [smem:[#allocation37_spill]] %s3563_s15  ;;  %s54_s9 = ssub.s32 %s2803_s17, %s3563_s15 }
  0x65   : > { %p55_p8 = scmp.eq.s32.totalorder %s54_s9, 0  ;;  %s344_s20 = sor.u32 %s343_s2, %s54_s9 }
  0x66   : > { %p345_p10 = scmp.eq.s32.totalorder %s344_s20, 0  ;;  %s1879_s22 = sshll.u32 %s3070_s11, 5 }
  0x67   : > { %s3077_s12 = scalar_select %p55_p8, %s2787_s30, %s57_s23  }
  0x68   : > { %s3519_s4 = sadd.s32 1, %s2775_s27  ;;  %s3520_s0 = sld [smem:[#allocation39_spill]] }
  0x69   : > { %3518 = sst [smem:[#allocation38_spill]] %s3077_s12  ;;  %s458_s13 = scalar_lea.vmem [#allocation6], %s1879_s22 }
  0x6a   : > { %s3082_s6 = scalar_select %p345_p10, %s2775_s27, %s3519_s4  }
  0x6b   : > { %s465_s7 = sshll.u32 %s458_s13, 4  ;;  %p3091_p1 = pnand %p2319_p2, %p3062_p11  ;;  %s466_s7 = int_to_ptr.vmem [resolvable:$true] %s465_s7 }
  0x6c   : > { %s475_s23 = sand.u32 1, %s2807_s18   ;;  %s455_s2 = scalar_lea.sflag [#allocation7], %s3070_s11 }
  0x6d   : > { %p2587_p3 = pneg %p3091_p1  ;;  %s2598_s4 = scalar_lea.vmem %s466_s7, 512 }
  0x6e   : > { %s464_s16 = scalar_lea.hbm %s3520_s0, %s1922_s24  ;;  %p2599_p13 = scmp.ne.s32.totalorder %s466_s7, %s2598_s4 }
  0x6f   : > { %s2815_s8 = smov [#allocation6]  }
  0x70   : > { %p2601_p6 = pnand %p2599_p13, %p2587_p3  ;;  %s2603_s22 = sshll.u32 %s2815_s8, 4  ;;  %s2604_s22 = int_to_ptr.vmem [resolvable:$false] %s2603_s22 }
  0x71   : > { %s2605_s25 = scalar_lea.vmem %s2604_s22, 1024  ;;  %p2606_p11 = scmp.lt.s32.totalorder %s466_s7, %s2604_s22 }
  0x72   : > { %p2602_p0 = pneg %p2601_p6  ;;  %p2607_p2 = scmp.lt.s32.totalorder %s2605_s25, %s2598_s4 }
  0x74   : > { %p2608_p8 = por %p2607_p2, %p2606_p11 }
  0x76   : > { %p2609_p10 = pnand %p2608_p8, %p2602_p0 }
  0x78   : > { %2612 = shalt.err (!%p2609_p10)
}
  0x79   : > { %s3522_s13 = smov 8   ;;  %s3523_s10 = smov 128  }
  0x7a   : > { %2304 = dma.hbm_to_vmem [thread:$0]  (!%p3091_p1), %s464_s16, 512, %s466_s7, %s455_s2, %s3523_s10, %s3523_s10, %s3522_s13  }
  0x7b   : > { %s1882_s24 = sshll.u32 %s2803_s17, 4  ;;  %s478_s0 = scalar_lea.vmem [#allocation9], %s3070_s11 }
  0x7c   : > { %s483_s8 = scalar_lea.hbm %s3450_s1, %s1882_s24  ;;  %s485_s22 = sshll.u32 %s478_s0, 4  ;;  %s486_s22 = int_to_ptr.vmem [resolvable:$true] %s485_s22 }
  0x7d   : > { %s476_s4 = scalar_lea.sflag [#allocation10], %s475_s23  ;;  %s2626_s25 = scalar_lea.vmem %s486_s22, 16 }
  0x7e   : > { %p2627_p13 = scmp.ne.s32.totalorder %s486_s22, %s2626_s25  ;;  %s2816_s15 = smov [#allocation9]  }
  0x7f   : > { %s2631_s12 = sshll.u32 %s2816_s15, 4  ;;  %s2632_s12 = int_to_ptr.vmem [resolvable:$false] %s2631_s12 }
  0x80   : > { %p2629_p6 = pnand %p2627_p13, %p2587_p3  ;;  %s2633_s30 = scalar_lea.vmem %s2632_s12, 32 }
  0x81   : > { %p2634_p11 = scmp.lt.s32.totalorder %s486_s22, %s2632_s12  ;;  %p2635_p2 = scmp.lt.s32.totalorder %s2633_s30, %s2626_s25 }
  0x82   : > { %p2630_p0 = pneg %p2629_p6 }
  0x83   : > { %p2636_p8 = por %p2635_p2, %p2634_p11 }
  0x85   : > { %p2637_p10 = pnand %p2636_p8, %p2630_p0 }
  0x87   : > { %2640 = shalt.err (!%p2637_p10)
}
  0x88   : > { %2307 = dma.hbm_to_vmem [thread:$0]  (!%p3091_p1), %s483_s8, 16, %s486_s22, %s476_s4  }
  0x89   : > { %494 = sbr.rel (%p2987_p12) target bundleno = 2061 (0x80d), region = 68  ;;  %s3120_s0 = sand.u32 (!%p2987_p12), 1, %s2783_s29  }
  0x8a   : > { %s1884_s7 = sshll.u32 (!%p2987_p12), %s3120_s0, 5  ;;  %s497_s16 = scalar_lea.sflag (!%p2987_p12), [#allocation7], %s3120_s0 }
  0x8b   : > { %s3124_s15 = scalar_lea.vmem (!%p2987_p12), [#allocation6], %s1884_s7 }
  0x8e   : > { %2738 = dma.done.wait (%p2962_p4), %s497_s16, 512  }
  0x8f   : > { %2740 = vsyncadd (%p2962_p4), %s497_s16, 4294966784  ;;  %s505_s5 = sand.u32 1, %s2953_s19   ;;  %s508_s28 = scalar_lea.vmem [#allocation9], %s3120_s0 }
  0x90   : > { %s506_s12 = scalar_lea.sflag [#allocation10], %s505_s5 }
  0x91   : > { %2742 = dma.done.wait (%p2962_p4), %s506_s12, 16  }
  0x92   : > { %2744 = vsyncadd (%p2962_p4), %s506_s12, 4294967280  ;;  %p3524_p12 = scmp.eq.s32.totalorder %s2953_s19, 0 }
  0x94   : > { %2746 = dma.done.wait (%p3524_p12), [#allocation10], 2048   ;;  %p3525_p1 = pmov %p3524_p12 }
  0x96   : > { %2748 = vsyncadd (%p3525_p1), [#allocation10], 4294965248  ;;  %p3526_p3 = pmov %p3525_p1 }
  0x97   : > { %p3527_p13 = pmov %p3525_p1 }
  0x98   : > { %2750 = dma.done.wait (%p3526_p3), [#allocation13], 4096  }
  0x99   : > { %2752 = vsyncadd (%p3527_p13), [#allocation13], 4294963200  ;;  %p3528_p6 = pmov %p3525_p1 }
  0x9a   : > { %p3529_p0 = pmov %p3525_p1 }
  0x9b   : > { %2754 = dma.done.wait (%p3528_p6), [#allocation16], 2048  }
  0x9c   : > { %2756 = vsyncadd (%p3529_p0), [#allocation16], 4294965248  ;;  %s573_s30 = sand.u32 1, %s2771_s26   ;;  %s3151_s11 = scalar_lea.vmem [#allocation17], %s1884_s7 }
  0x9d   : > { %s1890_s21 = sshll.u32 %s573_s30, 5  ;;  %p1891_p4 = scmp.ne.s32.totalorder %s2791_s14, 0 }
  0x9e   : > { %s3153_s23 = scalar_lea.vmem [#allocation18], %s1890_s21  ;;  %s3530_s24 = sld [smem:[#allocation42_spill]] (!%p1891_p4) }
  0x9f   : > { %579 = sbr.rel (%p1891_p4) target bundleno = 626 (0x272), region = 96  ;;  %s2817_s9 = smov (!%p1891_p4), 96  }
  0xa0   : > { %s2818_s20 = smov (!%p1891_p4), 64   ;;  %s2819_s8 = smov (!%p1891_p4), 32  }
  0xa1   : > { %s3531_s25 = sld [smem:[#allocation44_spill]] (!%p1891_p4) }
  0xa4   : > { %v599_v0 = vld [vmem:[#allocation11 + $0x78] sm:$0xff]  ;;  %v598_v2 = vld [vmem:[#allocation11 + $0x70] sm:$0xff]  ;;  %v597_v4 = vld [vmem:[#allocation11 + $0x68] sm:$0xff]  ;;  %vm908_vm0 = vcmask 261120  }
  0xa5   : > { %v707_v1 = vld [vmem:[#allocation12 + $0x78] sm:$0xff]  ;;  %2020 = vmatprep.subr.mxu0 %v599_v0  ;;  %v706_v3 = vld [vmem:[#allocation12 + $0x70] sm:$0xff]  ;;  %v705_v5 = vld [vmem:[#allocation12 + $0x68] sm:$0xff] }
  0xa6   : > { %2058 = vmatprep.subr.mxu1 %v707_v1  ;;  %2021 = vmatpush3.xpose.msra.mxu0 %v599_v0  ;;  %v596_v6 = vld [vmem:[#allocation11 + $0x60] sm:$0xff]  ;;  %v595_v9 = vld [vmem:[#allocation11 + $0x58] sm:$0xff]  ;;  %v594_v11 = vld [vmem:[#allocation11 + $0x50] sm:$0xff] }
  0xa7   : > { %2059 = vmatpush3.xpose.msra.mxu1 %v707_v1  ;;  %2022 = vmatprep.subr.mxu0 %v598_v2  ;;  %v704_v7 = vld [vmem:[#allocation12 + $0x60] sm:$0xff]  ;;  %v703_v10 = vld [vmem:[#allocation12 + $0x58] sm:$0xff]  ;;  %v702_v12 = vld [vmem:[#allocation12 + $0x50] sm:$0xff] }
  0xa8   : > { %2060 = vmatprep.subr.mxu1 %v706_v3  ;;  %v3157_v8 = vld [vmem:[%s3124_s15] sm:$0xff]  ;;  %v593_v13 = vld [vmem:[#allocation11 + $0x48] sm:$0xff]  ;;  %v590_v19 = vld [vmem:[#allocation11 + $0x30] sm:$0xff] }
  0xa9   : > { %2052 = vmatprep.mubr.f32.mxu0 %v3157_v8  ;;  %2090 = vmatprep.mubr.f32.mxu1 %v3157_v8  ;;  %v701_v14 = vld [vmem:[#allocation12 + $0x48] sm:$0xff]  ;;  %v592_v15 = vld [vmem:[#allocation11 + $0x40] sm:$0xff]  ;;  %v591_v17 = vld [vmem:[#allocation11 + $0x38] sm:$0xff] }
  0xaa   : > { %2023 = vmatpush3.xpose.msra.mxu0 %v598_v2  ;;  %v700_v16 = vld [vmem:[#allocation12 + $0x40] sm:$0xff]  ;;  %v699_v18 = vld [vmem:[#allocation12 + $0x38] sm:$0xff]  ;;  %v698_v20 = vld [vmem:[#allocation12 + $0x30] sm:$0xff] }
  0xab   : > { %2061 = vmatpush3.xpose.msra.mxu1 %v706_v3  ;;  %2024 = vmatprep.subr.mxu0 %v597_v4  ;;  %v589_v21 = vld [vmem:[#allocation11 + $0x28] sm:$0xff]  ;;  %v588_v23 = vld [vmem:[#allocation11 + $0x20] sm:$0xff]  ;;  %v587_v25 = vld [vmem:[#allocation11 + $0x18] sm:$0xff] }
  0xac   : > { %2062 = vmatprep.subr.mxu1 %v705_v5  ;;  %v697_v22 = vld [vmem:[#allocation12 + $0x28] sm:$0xff]  ;;  %v696_v24 = vld [vmem:[#allocation12 + $0x20] sm:$0xff]  ;;  %v695_v26 = vld [vmem:[#allocation12 + $0x18] sm:$0xff] }
  0xad   : > { %v586_v27 = vld [vmem:[#allocation11 + $0x10] sm:$0xff]  ;;  %v585_v29 = vld [vmem:[#allocation11 + $0x8] sm:$0xff]  ;;  %v584_v31 = vld [vmem:[#allocation11] sm:$0xff] }
  0xae   : > { %2025 = vmatpush3.xpose.msra.mxu0 %v597_v4  ;;  %v694_v28 = vld [vmem:[#allocation12 + $0x10] sm:$0xff]  ;;  %v693_v30 = vld [vmem:[#allocation12 + $0x8] sm:$0xff]  ;;  %v692_v32 = vld [vmem:[#allocation12] sm:$0xff] }
  0xaf   : > { %2063 = vmatpush3.xpose.msra.mxu1 %v705_v5  ;;  %2026 = vmatprep.subr.mxu0 %v596_v6  ;;  %v815_v33 = vld [vmem:[#allocation14 + $0x78] sm:$0xff]  ;;  %v3162_v34 = vld [vmem:[%s3124_s15 + $0x8] sm:$0xff]  ;;  %v814_v35 = vld [vmem:[#allocation14 + $0x70] sm:$0xff] }
  0xb0   : > { %2064 = vmatprep.subr.mxu1 %v704_v7  ;;  %v582_v36 = vld [vmem:[%s3124_s15 + $0x10] sm:$0xff]  ;;  %v3168_v37 = vld [vmem:[%s3124_s15 + $0x18] sm:$0xff]  ;;  %v812_v39 = vld [vmem:[#allocation14 + $0x60] sm:$0xff] }
  0xb1   : > { %v813_v38 = vld [vmem:[#allocation14 + $0x68] sm:$0xff]  ;;  %v811_v40 = vld [vmem:[#allocation14 + $0x58] sm:$0xff]  ;;  %v810_v41 = vld [vmem:[#allocation14 + $0x50] sm:$0xff] }
  0xb2   : > { %2027 = vmatpush3.xpose.msra.mxu0 %v596_v6  ;;  %v809_v42 = vld [vmem:[#allocation14 + $0x48] sm:$0xff]  ;;  %v808_v43 = vld [vmem:[#allocation14 + $0x40] sm:$0xff]  ;;  %v807_v44 = vld [vmem:[#allocation14 + $0x38] sm:$0xff] }
  0xb3   : > { %2065 = vmatpush3.xpose.msra.mxu1 %v704_v7  ;;  %2028 = vmatprep.subr.mxu0 %v595_v9  ;;  %v806_v45 = vld [vmem:[#allocation14 + $0x30] sm:$0xff]  ;;  %v805_v46 = vld [vmem:[#allocation14 + $0x28] sm:$0xff]  ;;  %v804_v47 = vld [vmem:[#allocation14 + $0x20] sm:$0xff] }
  0xb4   : > { %2066 = vmatprep.subr.mxu1 %v703_v10  ;;  %v803_v48 = vld [vmem:[#allocation14 + $0x18] sm:$0xff]  ;;  %v802_v49 = vld [vmem:[#allocation14 + $0x10] sm:$0xff]  ;;  %v801_v50 = vld [vmem:[#allocation14 + $0x8] sm:$0xff] }
  0xb5   : > { %v800_v51 = vld [vmem:[#allocation14] sm:$0xff]  ;;  %v1892_v52 = vld [vmem:[%s3452_s3] ss:$0 sm:$0xff] }
  0xb6   : > { %2029 = vmatpush3.xpose.msra.mxu0 %v595_v9  ;;  %v1893_v53 = vld [vmem:[%s3530_s24] ss:$0 sm:$0xff] }
  0xb7   : > { %2067 = vmatpush3.xpose.msra.mxu1 %v703_v10  ;;  %2030 = vmatprep.subr.mxu0 %v594_v11  ;;  %v1894_v6 = vld [vmem:[%s3531_s25] ss:$0 sm:$0xff] }
  0xb8   : > { %2068 = vmatprep.subr.mxu1 %v702_v12 }
  0xba   : > { %2031 = vmatpush3.xpose.msra.mxu0 %v594_v11 }
  0xbb   : > { %2069 = vmatpush3.xpose.msra.mxu1 %v702_v12  ;;  %2032 = vmatprep.subr.mxu0 %v593_v13 }
  0xbc   : > { %2070 = vmatprep.subr.mxu1 %v701_v14 }
  0xbe   : > { %2033 = vmatpush3.xpose.msra.mxu0 %v593_v13 }
  0xbf   : > { %2071 = vmatpush3.xpose.msra.mxu1 %v701_v14  ;;  %2034 = vmatprep.subr.mxu0 %v592_v15 }
  0xc0   : > { %2072 = vmatprep.subr.mxu1 %v700_v16 }
  0xc2   : > { %2035 = vmatpush3.xpose.msra.mxu0 %v592_v15 }
  0xc3   : > { %2073 = vmatpush3.xpose.msra.mxu1 %v700_v16  ;;  %2036 = vmatprep.subr.mxu0 %v591_v17 }
  0xc4   : > { %2074 = vmatprep.subr.mxu1 %v699_v18 }
  0xc6   : > { %2037 = vmatpush3.xpose.msra.mxu0 %v591_v17 }
  0xc7   : > { %2075 = vmatpush3.xpose.msra.mxu1 %v699_v18  ;;  %2038 = vmatprep.subr.mxu0 %v590_v19 }
  0xc8   : > { %2076 = vmatprep.subr.mxu1 %v698_v20 }
  0xca   : > { %2039 = vmatpush3.xpose.msra.mxu0 %v590_v19 }
  0xcb   : > { %2077 = vmatpush3.xpose.msra.mxu1 %v698_v20  ;;  %2040 = vmatprep.subr.mxu0 %v589_v21 }
  0xcc   : > { %2078 = vmatprep.subr.mxu1 %v697_v22 }
  0xce   : > { %2041 = vmatpush3.xpose.msra.mxu0 %v589_v21 }
  0xcf   : > { %2079 = vmatpush3.xpose.msra.mxu1 %v697_v22  ;;  %2042 = vmatprep.subr.mxu0 %v588_v23 }
  0xd0   : > { %2080 = vmatprep.subr.mxu1 %v696_v24 }
  0xd2   : > { %2043 = vmatpush3.xpose.msra.mxu0 %v588_v23 }
  0xd3   : > { %2081 = vmatpush3.xpose.msra.mxu1 %v696_v24  ;;  %2044 = vmatprep.subr.mxu0 %v587_v25 }
  0xd4   : > { %2082 = vmatprep.subr.mxu1 %v695_v26 }
  0xd6   : > { %2045 = vmatpush3.xpose.msra.mxu0 %v587_v25 }
  0xd7   : > { %2083 = vmatpush3.xpose.msra.mxu1 %v695_v26  ;;  %2046 = vmatprep.subr.mxu0 %v586_v27 }
  0xd8   : > { %2084 = vmatprep.subr.mxu1 %v694_v28 }
  0xda   : > { %2047 = vmatpush3.xpose.msra.mxu0 %v586_v27 }
  0xdb   : > { %2085 = vmatpush3.xpose.msra.mxu1 %v694_v28  ;;  %2048 = vmatprep.subr.mxu0 %v585_v29 }
  0xdc   : > { %2086 = vmatprep.subr.mxu1 %v693_v30 }
  0xde   : > { %2049 = vmatpush3.xpose.msra.mxu0 %v585_v29 }
  0xdf   : > { %2087 = vmatpush3.xpose.msra.mxu1 %v693_v30  ;;  %2050 = vmatprep.subr.mxu0 %v584_v31 }
  0xe0   : > { %2088 = vmatprep.subr.mxu1 %v692_v32 }
  0xe2   : > { %2051 = vmatpush3.xpose.msra.mxu0 %v584_v31 }
  0xe3   : > { %2089 = vmatpush3.xpose.msra.mxu1 %v692_v32  ;;  %2096 = vmatprep.subr.mxu0 %v815_v33 }
  0xe4   : > { %2200 = vmatprep.subr.mxu1 %v815_v33 }
  0xe5   : > { %2053 = vmatmul.mubr.f32.vlgmr.msra.gmra.mxu0 %v3162_v34 }
  0xe6   : > { %2091 = vmatmul.mubr.f32.vlgmr.msra.gmra.mxu1 %v3162_v34  ;;  %2097 = vmatpush3.xpose.msra.mxu0 %v815_v33 }
  0xe7   : > { %2216 = vmatpush3.xpose.msra.mxu1 %v815_v33  ;;  %2098 = vmatprep.subr.mxu0 %v814_v35 }
  0xe8   : > { %2201 = vmatprep.subr.mxu1 %v814_v35  ;;  %2055 = vmatprep.mubr.f32.mxu0 %v582_v36 }
  0xe9   : > { %2093 = vmatprep.mubr.f32.mxu1 %v582_v36  ;;  %2056 = vmatmul.mubr.f32.gmra.mxu0 %v3168_v37 }
  0xea   : > { %2094 = vmatmul.mubr.f32.gmra.mxu1 %v3168_v37  ;;  %2099 = vmatpush3.xpose.msra.mxu0 %v814_v35 }
  0xeb   : > { %2217 = vmatpush3.xpose.msra.mxu1 %v814_v35  ;;  %2100 = vmatprep.subr.mxu0 %v813_v38 }
  0xec   : > { %2202 = vmatprep.subr.mxu1 %v813_v38  ;;  %2128 = vmatprep.mubr.f32.mxu0 %v3157_v8 }
  0xed   : > { %2131 = vmatprep.mubr.f32.mxu1 %v582_v36 }
  0xee   : > { %2101 = vmatpush3.xpose.msra.mxu0 %v813_v38 }
  0xef   : > { %2218 = vmatpush3.xpose.msra.mxu1 %v813_v38  ;;  %2102 = vmatprep.subr.mxu0 %v812_v39 }
  0xf0   : > { %2203 = vmatprep.subr.mxu1 %v812_v39 }
  0xf2   : > { %2103 = vmatpush3.xpose.msra.mxu0 %v812_v39 }
  0xf3   : > { %2219 = vmatpush3.xpose.msra.mxu1 %v812_v39  ;;  %2104 = vmatprep.subr.mxu0 %v811_v40 }
  0xf4   : > { %2204 = vmatprep.subr.mxu1 %v811_v40 }
  0xf6   : > { %2105 = vmatpush3.xpose.msra.mxu0 %v811_v40 }
  0xf7   : > { %2220 = vmatpush3.xpose.msra.mxu1 %v811_v40  ;;  %2106 = vmatprep.subr.mxu0 %v810_v41 }
  0xf8   : > { %2205 = vmatprep.subr.mxu1 %v810_v41 }
  0xfa   : > { %2107 = vmatpush3.xpose.msra.mxu0 %v810_v41 }
  0xfb   : > { %2221 = vmatpush3.xpose.msra.mxu1 %v810_v41  ;;  %2108 = vmatprep.subr.mxu0 %v809_v42 }
  0xfc   : > { %2206 = vmatprep.subr.mxu1 %v809_v42 }
  0xfe   : > { %2109 = vmatpush3.xpose.msra.mxu0 %v809_v42 }
  0xff   : > { %2222 = vmatpush3.xpose.msra.mxu1 %v809_v42  ;;  %2110 = vmatprep.subr.mxu0 %v808_v43 }
 0x100   : > { %2207 = vmatprep.subr.mxu1 %v808_v43 }
 0x102   : > { %2111 = vmatpush3.xpose.msra.mxu0 %v808_v43 }
 0x103   : > { %2223 = vmatpush3.xpose.msra.mxu1 %v808_v43  ;;  %2112 = vmatprep.subr.mxu0 %v807_v44 }
 0x104   : > { %2208 = vmatprep.subr.mxu1 %v807_v44 }
 0x106   : > { %2113 = vmatpush3.xpose.msra.mxu0 %v807_v44 }
 0x107   : > { %2224 = vmatpush3.xpose.msra.mxu1 %v807_v44  ;;  %2114 = vmatprep.subr.mxu0 %v806_v45 }
 0x108   : > { %2209 = vmatprep.subr.mxu1 %v806_v45 }
 0x10a   : > { %2115 = vmatpush3.xpose.msra.mxu0 %v806_v45 }
 0x10b   : > { %2225 = vmatpush3.xpose.msra.mxu1 %v806_v45  ;;  %2116 = vmatprep.subr.mxu0 %v805_v46 }
 0x10c   : > { %2210 = vmatprep.subr.mxu1 %v805_v46 }
 0x10e   : > { %2117 = vmatpush3.xpose.msra.mxu0 %v805_v46 }
 0x10f   : > { %2226 = vmatpush3.xpose.msra.mxu1 %v805_v46  ;;  %2118 = vmatprep.subr.mxu0 %v804_v47 }
 0x110   : > { %2211 = vmatprep.subr.mxu1 %v804_v47 }
 0x112   : > { %2119 = vmatpush3.xpose.msra.mxu0 %v804_v47 }
 0x113   : > { %2227 = vmatpush3.xpose.msra.mxu1 %v804_v47  ;;  %2120 = vmatprep.subr.mxu0 %v803_v48 }
 0x114   : > { %2212 = vmatprep.subr.mxu1 %v803_v48 }
 0x116   : > { %2121 = vmatpush3.xpose.msra.mxu0 %v803_v48 }
 0x117   : > { %2228 = vmatpush3.xpose.msra.mxu1 %v803_v48  ;;  %2122 = vmatprep.subr.mxu0 %v802_v49 }
 0x118   : > { %2213 = vmatprep.subr.mxu1 %v802_v49 }
 0x11a   : > { %2123 = vmatpush3.xpose.msra.mxu0 %v802_v49 }
 0x11b   : > { %2229 = vmatpush3.xpose.msra.mxu1 %v802_v49  ;;  %2124 = vmatprep.subr.mxu0 %v801_v50 }
 0x11c   : > { %2214 = vmatprep.subr.mxu1 %v801_v50 }
 0x11e   : > { %2125 = vmatpush3.xpose.msra.mxu0 %v801_v50 }
 0x11f   : > { %2230 = vmatpush3.xpose.msra.mxu1 %v801_v50  ;;  %2126 = vmatprep.subr.mxu0 %v800_v51 }
 0x120   : > { %2215 = vmatprep.subr.mxu1 %v800_v51 }
 0x122   : > { %2127 = vmatpush3.xpose.msra.mxu0 %v800_v51 }
 0x123   : > { %2231 = vmatpush3.xpose.msra.mxu1 %v800_v51 }
 0x125   : > { %2129 = vmatmul.mubr.f32.vlgmr.msra.gmra.mxu0 %v3162_v34 }
 0x126   : > { %2132 = vmatmul.mubr.f32.vlgmr.msra.gmra.mxu1 %v3168_v37 }
 0x1a5   : > { %v2054_v54 = vpop.f32.mrf.mxu0 }
 0x1a6   : > { %v2092_v55 = vpop.f32.mrf.mxu1  ;;  %v679_v56 = vadd.f32 %v2054_v54, %v1892_v52 }
 0x1a7   : > { %v787_v57 = vadd.f32 %v2092_v55, %v1893_v53  ;;  %v673_v58 = vpop.f32.mrf.mxu0 }
 0x1a8   : > { %v781_v59 = vpop.f32.mrf.mxu1  ;;  %910 = vst.msk [vmem:[#allocation2 + $0x8] sm:$0xff] %vm908_vm0, %v679_v56  ;;  %v674_v60 = vadd.f32 %v1892_v52, %v673_v58  ;;  %927 = vrot.lane.b32.xlu0 %v679_v56, %s2817_s9 }
 0x1a9   : > { %914 = vst.msk [vmem:[#allocation3 + $0x8] sm:$0xff] %vm908_vm0, %v787_v57  ;;  %948 = vrot.lane.b32.xlu1 %v787_v57, %s2817_s9  ;;  %v782_v61 = vadd.f32 %v1893_v53, %v781_v59  ;;  %v2057_v62 = vpop.f32.mrf.mxu0 }
 0x1aa   : > { %v2095_v63 = vpop.f32.mrf.mxu1  ;;  %909 = vst.msk [vmem:[#allocation2] sm:$0xff] %vm908_vm0, %v674_v60  ;;  %v689_v0 = vadd.f32 %v2057_v62, %v1892_v52 }
 0x1ab   : > { %913 = vst.msk [vmem:[#allocation3] sm:$0xff] %vm908_vm0, %v782_v61  ;;  %v797_v1 = vadd.f32 %v2095_v63, %v1893_v53  ;;  %v683_v3 = vpop.f32.mrf.mxu0 }
 0x1ac   : > { %v791_v2 = vpop.f32.mrf.mxu1  ;;  %925 = vrot.lane.b32.xlu0 %v674_v60, %s2817_s9  ;;  %912 = vst.msk [vmem:[#allocation2 + $0x18] sm:$0xff] %vm908_vm0, %v689_v0  ;;  %v684_v5 = vadd.f32 %v1892_v52, %v683_v3 }
 0x1ad   : > { %986 = vrot.lane.b32.xlu1 %v679_v56, %s2818_s20  ;;  %916 = vst.msk [vmem:[#allocation3 + $0x18] sm:$0xff] %vm908_vm0, %v797_v1  ;;  %v792_v4 = vadd.f32 %v1893_v53, %v791_v2 }
 0x1ae   : > { %911 = vst.msk [vmem:[#allocation2 + $0x10] sm:$0xff] %vm908_vm0, %v684_v5 }
 0x1af   : > { %915 = vst.msk [vmem:[#allocation3 + $0x10] sm:$0xff] %vm908_vm0, %v792_v4 }
 0x1b0   : > { %946 = vrot.lane.b32.xlu0 %v782_v61, %s2817_s9 }
 0x1b1   : > { %1003 = vrot.lane.b32.xlu1 %v787_v57, %s2818_s20 }
 0x1b4   : > { %984 = vrot.lane.b32.xlu0 %v674_v60, %s2818_s20 }
 0x1b5   : > { %1037 = vrot.lane.b32.xlu1 %v679_v56, %s2819_s8 }
 0x1b8   : > { %1001 = vrot.lane.b32.xlu0 %v782_v61, %s2818_s20 }
 0x1b9   : > { %1054 = vrot.lane.b32.xlu1 %v787_v57, %s2819_s8 }
 0x1bc   : > { %1035 = vrot.lane.b32.xlu0 %v674_v60, %s2819_s8 }
 0x1bd   : > { %931 = vrot.lane.b32.xlu1 %v689_v0, %s2817_s9 }
 0x1c0   : > { %1052 = vrot.lane.b32.xlu0 %v782_v61, %s2819_s8 }
 0x1c1   : > { %952 = vrot.lane.b32.xlu1 %v797_v1, %s2817_s9 }
 0x1c4   : > { %950 = vrot.lane.b32.xlu0 %v792_v4, %s2817_s9 }
 0x1c5   : > { %990 = vrot.lane.b32.xlu1 %v689_v0, %s2818_s20 }
 0x1c8   : > { %988 = vrot.lane.b32.xlu0 %v684_v5, %s2818_s20 }
 0x1c9   : > { %1007 = vrot.lane.b32.xlu1 %v797_v1, %s2818_s20 }
 0x1cc   : > { %1005 = vrot.lane.b32.xlu0 %v792_v4, %s2818_s20 }
 0x1cd   : > { %1041 = vrot.lane.b32.xlu1 %v689_v0, %s2819_s8 }
 0x1d0   : > { %1039 = vrot.lane.b32.xlu0 %v684_v5, %s2819_s8 }
 0x1d1   : > { %1058 = vrot.lane.b32.xlu1 %v797_v1, %s2819_s8 }
 0x1d4   : > { %1056 = vrot.lane.b32.xlu0 %v792_v4, %s2819_s8 }
 0x1d5   : > { %929 = vrot.lane.b32.xlu1 %v684_v5, %s2817_s9 }
 0x1e5   : > { %v2130_v7 = vpop.f32.mrf.mxu0 }
 0x1e6   : > { %v2133_v8 = vpop.f32.mrf.mxu1  ;;  %v895_v9 = vadd.f32 %v2130_v7, %v1894_v6 }
 0x1e7   : > { %v905_v10 = vadd.f32 %v2133_v8, %v1894_v6  ;;  %v889_v11 = vpop.f32.mrf.mxu0 }
 0x1e8   : > { %v899_v12 = vpop.f32.mrf.mxu1  ;;  %918 = vst.msk [vmem:[#allocation4 + $0x8] sm:$0xff] %vm908_vm0, %v895_v9  ;;  %v890_v13 = vadd.f32 %v1894_v6, %v889_v11  ;;  %969 = vrot.lane.b32.xlu1 %v895_v9, %s2817_s9 }
 0x1e9   : > { %920 = vst.msk [vmem:[#allocation4 + $0x18] sm:$0xff] %vm908_vm0, %v905_v10  ;;  %v900_v14 = vadd.f32 %v1894_v6, %v899_v12 }
 0x1ea   : > { %917 = vst.msk [vmem:[#allocation4] sm:$0xff] %vm908_vm0, %v890_v13  ;;  %967 = vrot.lane.b32.xlu0 %v890_v13, %s2817_s9 }
 0x1eb   : > { %919 = vst.msk [vmem:[#allocation4 + $0x10] sm:$0xff] %vm908_vm0, %v900_v14 }
 0x1ec   : > { %973 = vrot.lane.b32.xlu1 %v905_v10, %s2817_s9 }
 0x1ee   : > { %971 = vrot.lane.b32.xlu0 %v900_v14, %s2817_s9 }
 0x1f0   : > { %1020 = vrot.lane.b32.xlu1 %v895_v9, %s2818_s20 }
 0x1f2   : > { %1018 = vrot.lane.b32.xlu0 %v890_v13, %s2818_s20 }
 0x1f4   : > { %1024 = vrot.lane.b32.xlu1 %v905_v10, %s2818_s20 }
 0x1f6   : > { %1022 = vrot.lane.b32.xlu0 %v900_v14, %s2818_s20 }
 0x1f8   : > { %1071 = vrot.lane.b32.xlu1 %v895_v9, %s2819_s8 }
 0x1fa   : > { %1069 = vrot.lane.b32.xlu0 %v890_v13, %s2819_s8 }
 0x1fc   : > { %1075 = vrot.lane.b32.xlu1 %v905_v10, %s2819_s8 }
 0x1fe   : > { %1073 = vrot.lane.b32.xlu0 %v900_v14, %s2819_s8 }
 0x21a   : > { %v928_v16 = vpop.permute.xlu0 %927 }
 0x21b   : > { %v949_v15 = vpop.permute.xlu1 %948  ;;  %939 = vst.msk [vmem:[#allocation2 + $0x28] sm:$0xff] %vm908_vm0, %v928_v16 }
 0x21c   : > { %960 = vst.msk [vmem:[#allocation3 + $0x28] sm:$0xff] %vm908_vm0, %v949_v15 }
 0x21e   : > { %v926_v18 = vpop.permute.xlu0 %925 }
 0x21f   : > { %v987_v17 = vpop.permute.xlu1 %986  ;;  %938 = vst.msk [vmem:[#allocation2 + $0x20] sm:$0xff] %vm908_vm0, %v926_v18 }
 0x220   : > { %998 = vst.msk [vmem:[#allocation2 + $0x48] sm:$0xff] %vm908_vm0, %v987_v17 }
 0x222   : > { %v947_v20 = vpop.permute.xlu0 %946 }
 0x223   : > { %v1004_v19 = vpop.permute.xlu1 %1003  ;;  %959 = vst.msk [vmem:[#allocation3 + $0x20] sm:$0xff] %vm908_vm0, %v947_v20 }
 0x224   : > { %1015 = vst.msk [vmem:[#allocation3 + $0x48] sm:$0xff] %vm908_vm0, %v1004_v19 }
 0x226   : > { %v985_v22 = vpop.permute.xlu0 %984 }
 0x227   : > { %v1038_v21 = vpop.permute.xlu1 %1037  ;;  %997 = vst.msk [vmem:[#allocation2 + $0x40] sm:$0xff] %vm908_vm0, %v985_v22 }
 0x228   : > { %1049 = vst.msk [vmem:[#allocation2 + $0x68] sm:$0xff] %vm908_vm0, %v1038_v21 }
 0x22a   : > { %v1002_v24 = vpop.permute.xlu0 %1001 }
 0x22b   : > { %v1055_v23 = vpop.permute.xlu1 %1054  ;;  %1014 = vst.msk [vmem:[#allocation3 + $0x40] sm:$0xff] %vm908_vm0, %v1002_v24 }
 0x22c   : > { %1066 = vst.msk [vmem:[#allocation3 + $0x68] sm:$0xff] %vm908_vm0, %v1055_v23 }
 0x22e   : > { %v1036_v26 = vpop.permute.xlu0 %1035 }
 0x22f   : > { %v932_v25 = vpop.permute.xlu1 %931  ;;  %1048 = vst.msk [vmem:[#allocation2 + $0x60] sm:$0xff] %vm908_vm0, %v1036_v26 }
 0x230   : > { %941 = vst.msk [vmem:[#allocation2 + $0x38] sm:$0xff] %vm908_vm0, %v932_v25 }
 0x232   : > { %v1053_v28 = vpop.permute.xlu0 %1052 }
 0x233   : > { %v953_v27 = vpop.permute.xlu1 %952  ;;  %1065 = vst.msk [vmem:[#allocation3 + $0x60] sm:$0xff] %vm908_vm0, %v1053_v28 }
 0x234   : > { %962 = vst.msk [vmem:[#allocation3 + $0x38] sm:$0xff] %vm908_vm0, %v953_v27 }
 0x236   : > { %v951_v30 = vpop.permute.xlu0 %950 }
 0x237   : > { %v991_v29 = vpop.permute.xlu1 %990  ;;  %961 = vst.msk [vmem:[#allocation3 + $0x30] sm:$0xff] %vm908_vm0, %v951_v30 }
 0x238   : > { %1000 = vst.msk [vmem:[#allocation2 + $0x58] sm:$0xff] %vm908_vm0, %v991_v29 }
 0x23a   : > { %v989_v32 = vpop.permute.xlu0 %988 }
 0x23b   : > { %v1008_v31 = vpop.permute.xlu1 %1007  ;;  %999 = vst.msk [vmem:[#allocation2 + $0x50] sm:$0xff] %vm908_vm0, %v989_v32 }
 0x23c   : > { %1017 = vst.msk [vmem:[#allocation3 + $0x58] sm:$0xff] %vm908_vm0, %v1008_v31 }
 0x23e   : > { %v1006_v34 = vpop.permute.xlu0 %1005 }
 0x23f   : > { %v1042_v33 = vpop.permute.xlu1 %1041  ;;  %1016 = vst.msk [vmem:[#allocation3 + $0x50] sm:$0xff] %vm908_vm0, %v1006_v34 }
 0x240   : > { %1051 = vst.msk [vmem:[#allocation2 + $0x78] sm:$0xff] %vm908_vm0, %v1042_v33 }
 0x242   : > { %v1040_v36 = vpop.permute.xlu0 %1039 }
 0x243   : > { %v1059_v35 = vpop.permute.xlu1 %1058  ;;  %1050 = vst.msk [vmem:[#allocation2 + $0x70] sm:$0xff] %vm908_vm0, %v1040_v36 }
 0x244   : > { %1068 = vst.msk [vmem:[#allocation3 + $0x78] sm:$0xff] %vm908_vm0, %v1059_v35 }
 0x246   : > { %v1057_v38 = vpop.permute.xlu0 %1056 }
 0x247   : > { %v930_v37 = vpop.permute.xlu1 %929  ;;  %1067 = vst.msk [vmem:[#allocation3 + $0x70] sm:$0xff] %vm908_vm0, %v1057_v38 }
 0x248   : > { %940 = vst.msk [vmem:[#allocation2 + $0x30] sm:$0xff] %vm908_vm0, %v930_v37 }
 0x25a   : > { %v970_v39 = vpop.permute.xlu1 %969 }
 0x25b   : > { %981 = vst.msk [vmem:[#allocation4 + $0x28] sm:$0xff] %vm908_vm0, %v970_v39 }
 0x25c   : > { %v968_v40 = vpop.permute.xlu0 %967 }
 0x25d   : > { %980 = vst.msk [vmem:[#allocation4 + $0x20] sm:$0xff] %vm908_vm0, %v968_v40 }
 0x25e   : > { %v974_v41 = vpop.permute.xlu1 %973 }
 0x25f   : > { %983 = vst.msk [vmem:[#allocation4 + $0x38] sm:$0xff] %vm908_vm0, %v974_v41 }
 0x260   : > { %v972_v42 = vpop.permute.xlu0 %971 }
 0x261   : > { %982 = vst.msk [vmem:[#allocation4 + $0x30] sm:$0xff] %vm908_vm0, %v972_v42 }
 0x262   : > { %v1021_v43 = vpop.permute.xlu1 %1020 }
 0x263   : > { %1032 = vst.msk [vmem:[#allocation4 + $0x48] sm:$0xff] %vm908_vm0, %v1021_v43 }
 0x264   : > { %v1019_v44 = vpop.permute.xlu0 %1018 }
 0x265   : > { %1031 = vst.msk [vmem:[#allocation4 + $0x40] sm:$0xff] %vm908_vm0, %v1019_v44 }
 0x266   : > { %v1025_v45 = vpop.permute.xlu1 %1024 }
 0x267   : > { %1034 = vst.msk [vmem:[#allocation4 + $0x58] sm:$0xff] %vm908_vm0, %v1025_v45 }
 0x268   : > { %v1023_v46 = vpop.permute.xlu0 %1022 }
 0x269   : > { %1033 = vst.msk [vmem:[#allocation4 + $0x50] sm:$0xff] %vm908_vm0, %v1023_v46 }
 0x26a   : > { %v1072_v47 = vpop.permute.xlu1 %1071 }
 0x26b   : > { %1083 = vst.msk [vmem:[#allocation4 + $0x68] sm:$0xff] %vm908_vm0, %v1072_v47 }
 0x26c   : > { %v1070_v48 = vpop.permute.xlu0 %1069 }
 0x26d   : > { %1082 = vst.msk [vmem:[#allocation4 + $0x60] sm:$0xff] %vm908_vm0, %v1070_v48 }
 0x26e   : > { %v1076_v49 = vpop.permute.xlu1 %1075 }
 0x26f   : > { %1085 = vst.msk [vmem:[#allocation4 + $0x78] sm:$0xff] %vm908_vm0, %v1076_v49 }
 0x270   : > { %v1074_v50 = vpop.permute.xlu0 %1073 }
 0x271   : > { %1084 = vst.msk [vmem:[#allocation4 + $0x70] sm:$0xff] %vm908_vm0, %v1074_v50 }
 0x272 PF: > { %s3269_s7 = sshll.u32 %s2791_s14, 5  ;;  %vm1102_vm1 = vcmask 261120   ;;  %v1904_v0 = vld [vmem:[%s508_s28] ss:$0 sm:$0xff]  ;;  %p1909_p11 = scmp.ne.s32.totalorder %s2791_s14, 3 }
 0x273   : > { %s1092_s16 = scalar_lea.vmem [#allocation3], %s3269_s7  ;;  %s1087_s5 = scalar_lea.vmem [#allocation2], %s3269_s7 }
 0x274   : > { %v1096_v51 = vld [vmem:[%s1092_s16 + $0x18] sm:$0xff]  ;;  %v1095_v52 = vld [vmem:[%s1092_s16 + $0x10] sm:$0xff]  ;;  %v1088_v53 = vld [vmem:[%s1087_s5] sm:$0xff]  ;;  %s1097_s12 = scalar_lea.vmem [#allocation4], %s3269_s7  ;;  %s1372_s28 = scalar_lea.vmem [#allocation5], %s3269_s7 }
 0x275   : > { %2134 = vmatprep.subr.msk.mxu0 %vm1102_vm1, %v1096_v51  ;;  %2142 = vmatprep.mubr.msk.f32.mxu0 %vm1102_vm1, %v1088_v53  ;;  %v1094_v54 = vld [vmem:[%s1092_s16 + $0x8] sm:$0xff]  ;;  %v1093_v55 = vld [vmem:[%s1092_s16] sm:$0xff]  ;;  %v1090_v57 = vld [vmem:[%s1087_s5 + $0x10] sm:$0xff]  ;;  %s2820_s21 = smov (!%p1909_p11), 64   ;;  %s2821_s19 = smov (!%p1909_p11), 32  }
 0x276   : > { %2135 = vmatpush3.xpose.msk.msra.mxu0 %vm1102_vm1, %v1096_v51  ;;  %v1089_v56 = vld [vmem:[%s1087_s5 + $0x8] sm:$0xff]  ;;  %v1091_v58 = vld [vmem:[%s1087_s5 + $0x18] sm:$0xff]  ;;  %s2822_s2 = smov (!%p1909_p11), 96   ;;  %s3532_s24 = sld [smem:[#allocation46_spill]] (!%p1909_p11) }
 0x277   : > { %2136 = vmatprep.subr.msk.mxu0 %vm1102_vm1, %v1095_v52  ;;  %s3533_s20 = sld [smem:[#allocation47_spill]] (!%p1909_p11) }
 0x278   : > { %v1101_v32 = vld [vmem:[%s1097_s12 + $0x18] sm:$0xff]  ;;  %v1100_v33 = vld [vmem:[%s1097_s12 + $0x10] sm:$0xff]  ;;  %v1099_v34 = vld [vmem:[%s1097_s12 + $0x8] sm:$0xff]  ;;  %s3534_s4 = sld [smem:[#allocation48_spill]] (!%p1909_p11) }
 0x279   : > { %2148 = vmatprep.subr.mxu1 %v1101_v32  ;;  %v1098_v35 = vld [vmem:[%s1097_s12] sm:$0xff] }
 0x27a   : > { %2137 = vmatpush3.xpose.msk.msra.mxu0 %vm1102_vm1, %v1095_v52  ;;  %2149 = vmatpush3.msra.mxu1 %v1101_v32 }
 0x27b   : > { %2138 = vmatprep.subr.msk.mxu0 %vm1102_vm1, %v1094_v54  ;;  %2150 = vmatprep.subr.mxu1 %v1100_v33 }
 0x27c   : > { %2151 = vmatpush3.msra.mxu1 %v1100_v33 }
 0x27d   : > { %2152 = vmatprep.subr.mxu1 %v1099_v34 }
 0x27e   : > { %2139 = vmatpush3.xpose.msk.msra.mxu0 %vm1102_vm1, %v1094_v54  ;;  %2153 = vmatpush3.msra.mxu1 %v1099_v34 }
 0x27f   : > { %2140 = vmatprep.subr.msk.mxu0 %vm1102_vm1, %v1093_v55  ;;  %2154 = vmatprep.subr.mxu1 %v1098_v35 }
 0x280   : > { %2155 = vmatpush3.msra.mxu1 %v1098_v35 }
 0x282   : > { %2141 = vmatpush3.xpose.msk.msra.mxu0 %vm1102_vm1, %v1093_v55 }
 0x285   : > { %2143 = vmatmul.mubr.msk.f32.vlgmr.msra.gmra.mxu0 %vm1102_vm1, %v1089_v56 }
 0x286   : > { %2145 = vmatprep.mubr.msk.f32.mxu0 %vm1102_vm1, %v1090_v57 }
 0x289   : > { %2146 = vmatmul.mubr.msk.f32.gmra.mxu0 %vm1102_vm1, %v1091_v58 }
 0x345   : > { %v2144_v59 = vpop.f32.mrf.mxu0 }
 0x346   : > { %v1213_v61 = vmul.f32 0.17677669, %v2144_v59 }
 0x347   : > { %v1193_v60 = vpop.f32.mrf.mxu0 }
 0x348   : > { %v1212_v62 = vmul.f32 0.17677669, %v1193_v60  ;;  %v1224_v6 = vadd.f32 %v1904_v0, %v1213_v61 }
 0x349   : > { %v2147_v63 = vpop.f32.mrf.mxu0 }
 0x34a   : > { %v1223_v1 = vadd.f32 %v1904_v0, %v1212_v62  ;;  %v1215_v3 = vmul.f32 0.17677669, %v2147_v63  ;;  %v1230_v8 = vsel %vm1102_vm1, %v1224_v6, -inf }
 0x34b   : > { %v1203_v2 = vpop.f32.mrf.mxu0 }
 0x34c   : > { %v1214_v4 = vmul.f32 0.17677669, %v1203_v2  ;;  %v1227_v5 = vsel %vm1102_vm1, %v1223_v1, -inf  ;;  %v1226_v10 = vadd.f32 %v1904_v0, %v1215_v3 }
 0x34d   : > { %1228 = vmax.xlane.f32.xlu0 %v1227_v5 }
 0x34e   : > { %v1225_v7 = vadd.f32 %v1904_v0, %v1214_v4  ;;  %v1236_v11 = vsel %vm1102_vm1, %v1226_v10, -inf }
 0x350   : > { %v1233_v9 = vsel %vm1102_vm1, %v1225_v7, -inf }
 0x351   : > { %1231 = vmax.xlane.f32.xlu0 %v1230_v8  ;;  %1234 = vmax.xlane.f32.xlu1 %v1233_v9 }
 0x355   : > { %1237 = vmax.xlane.f32.xlu1 %v1236_v11 }
 0x3d6   : > { %v1229_v12 = vpop.xlane.xlu0 %1228 }
 0x3d7   : > { %v1239_v13 = vsub.f32 %v1223_v1, %v1229_v12 }
 0x3d9   : > { %v1243_v14 = vmul.f32 1.442695, %v1239_v13 }
 0x3da   : > { %v1232_v15 = vpop.xlane.xlu0 %1231  ;;  %v1235_v16 = vpop.xlane.xlu1 %1234 }
 0x3db   : > { %2427 = vpow2.f32 %v1243_v14  ;;  %v1240_v17 = vsub.f32 %v1224_v6, %v1232_v15  ;;  %v1241_v18 = vsub.f32 %v1225_v7, %v1235_v16 }
 0x3dd   : > { %v1245_v19 = vmul.f32 1.442695, %v1240_v17  ;;  %v1247_v20 = vmul.f32 1.442695, %v1241_v18 }
 0x3de   : > { %v1238_v21 = vpop.xlane.xlu1 %1237 }
 0x3df   : > { %2429 = vpow2.f32 %v1245_v19  ;;  %v1242_v22 = vsub.f32 %v1226_v10, %v1238_v21 }
 0x3e0   : > { %2431 = vpow2.f32 %v1247_v20 }
 0x3e1   : > { %v1249_v23 = vmul.f32 1.442695, %v1242_v22 }
 0x3e3   : > { %2433 = vpow2.f32 %v1249_v23 }
 0x3e8   : > { %v2428_v24 = vpop.eup %2427 }
 0x3e9   : > { %v1251_v25 = vsel %vm1102_vm1, %v2428_v24, 0.0 }
 0x3ea   : > { %1252 = vadd.xlane.f32.xlu0 %v1251_v25 }
 0x3ec   : > { %v2430_v26 = vpop.eup %2429 }
 0x3ed   : > { %v2432_v27 = vpop.eup %2431  ;;  %v1254_v28 = vsel %vm1102_vm1, %v2430_v26, 0.0 }
 0x3ee   : > { %1255 = vadd.xlane.f32.xlu1 %v1254_v28  ;;  %v1257_v29 = vsel %vm1102_vm1, %v2432_v27, 0.0 }
 0x3ef   : > { %1258 = vadd.xlane.f32.xlu0 %v1257_v29 }
 0x3f0   : > { %v2434_v30 = vpop.eup %2433 }
 0x3f1   : > { %v1260_v31 = vsel %vm1102_vm1, %v2434_v30, 0.0 }
 0x3f2   : > { %1261 = vadd.xlane.f32.xlu1 %v1260_v31 }
 0x473   : > { %v1253_v36 = vpop.xlane.xlu0 %1252 }
 0x474   : > { %2435 = vrcp.f32 %v1253_v36 }
 0x477   : > { %v1256_v37 = vpop.xlane.xlu1 %1255 }
 0x478   : > { %v1259_v38 = vpop.xlane.xlu0 %1258  ;;  %2437 = vrcp.f32 %v1256_v37 }
 0x479   : > { %2439 = vrcp.f32 %v1259_v38 }
 0x47b   : > { %v1262_v39 = vpop.xlane.xlu1 %1261 }
 0x47c   : > { %2441 = vrcp.f32 %v1262_v39 }
 0x481   : > { %v2436_v40 = vpop.eup %2435 }
 0x482   : > { %v1267_v41 = vmul.f32 %v2436_v40, %v2428_v24 }
 0x484   : > { %1271 = vst.msk [vmem:[%s3153_s23] sm:$0xff] %vm1102_vm1, %v1267_v41  ;;  %2156 = vmatprep.mubr.msk.f32.mxu1 %vm1102_vm1, %v1267_v41 }
 0x485   : > { %v2438_v42 = vpop.eup %2437 }
 0x486   : > { %v2440_v43 = vpop.eup %2439  ;;  %v1268_v44 = vmul.f32 %v2438_v42, %v2430_v26 }
 0x487   : > { %v1269_v45 = vmul.f32 %v2440_v43, %v2432_v27 }
 0x488   : > { %1272 = vst.msk [vmem:[%s3153_s23 + $0x8] sm:$0xff] %vm1102_vm1, %v1268_v44  ;;  %2157 = vmatmul.mubr.msk.f32.vlgmr.msra.gmra.mxu1 %vm1102_vm1, %v1268_v44 }
 0x489   : > { %v2442_v46 = vpop.eup %2441  ;;  %1273 = vst.msk [vmem:[%s3153_s23 + $0x10] sm:$0xff] %vm1102_vm1, %v1269_v45  ;;  %2159 = vmatprep.mubr.msk.f32.mxu1 %vm1102_vm1, %v1269_v45 }
 0x48a   : > { %v1270_v47 = vmul.f32 %v2442_v46, %v2434_v30 }
 0x48c   : > { %1274 = vst.msk [vmem:[%s3153_s23 + $0x18] sm:$0xff] %vm1102_vm1, %v1270_v47  ;;  %2160 = vmatmul.mubr.msk.f32.gmra.mxu1 %vm1102_vm1, %v1270_v47 }
 0x548   : > { %v2158_v48 = vpop.f32.mrf.mxu1 }
 0x549   : > { %1374 = vst.msk [vmem:[%s1372_s28 + $0x8] sm:$0xff] %vm1102_vm1, %v2158_v48 }
 0x54a   : > { %v1353_v49 = vpop.f32.mrf.mxu1 }
 0x54b   : > { %1373 = vst.msk [vmem:[%s1372_s28] sm:$0xff] %vm1102_vm1, %v1353_v49  ;;  %1380 = sbr.rel (%p1909_p11) target bundleno = 2011 (0x7db), region = 100 }
 0x54c   : > { %v2161_v50 = vpop.f32.mrf.mxu1 }
 0x54d   : > { %1376 = vst.msk [vmem:[%s1372_s28 + $0x18] sm:$0xff] %vm1102_vm1, %v2161_v50 }
 0x54e   : > { %v1363_v51 = vpop.f32.mrf.mxu1 }
 0x54f   : > { %1375 = vst.msk [vmem:[%s1372_s28 + $0x10] sm:$0xff] %vm1102_vm1, %v1363_v51 }
 0x550   : > { %v1477_v2 = vld [vmem:[#allocation15 + $0x78] sm:$0xff]  ;;  %v1476_v3 = vld [vmem:[#allocation15 + $0x70] sm:$0xff]  ;;  %v1475_v8 = vld [vmem:[#allocation15 + $0x68] sm:$0xff]  ;;  %vm1452_vm2 = vcmask 523264   ;;  %vm1457_vm3 = vcmask 785408  }
 0x551   : > { %2162 = vmatprep.subr.mxu0 %v1477_v2  ;;  %2232 = vmatprep.subr.mxu1 %v1477_v2  ;;  %v1474_v9 = vld [vmem:[#allocation15 + $0x60] sm:$0xff]  ;;  %v1473_v10 = vld [vmem:[#allocation15 + $0x58] sm:$0xff]  ;;  %v1472_v11 = vld [vmem:[#allocation15 + $0x50] sm:$0xff] }
 0x552   : > { %2163 = vmatpush3.xpose.msra.mxu0 %v1477_v2  ;;  %2248 = vmatpush3.xpose.msra.mxu1 %v1477_v2  ;;  %v1471_v12 = vld [vmem:[#allocation15 + $0x48] sm:$0xff]  ;;  %v1470_v13 = vld [vmem:[#allocation15 + $0x40] sm:$0xff]  ;;  %v1469_v14 = vld [vmem:[#allocation15 + $0x38] sm:$0xff] }
 0x553   : > { %2164 = vmatprep.subr.mxu0 %v1476_v3  ;;  %2233 = vmatprep.subr.mxu1 %v1476_v3  ;;  %v1468_v15 = vld [vmem:[#allocation15 + $0x30] sm:$0xff]  ;;  %v1467_v16 = vld [vmem:[#allocation15 + $0x28] sm:$0xff]  ;;  %v1466_v17 = vld [vmem:[#allocation15 + $0x20] sm:$0xff] }
 0x554   : > { %v1465_v18 = vld [vmem:[#allocation15 + $0x18] sm:$0xff]  ;;  %v1464_v19 = vld [vmem:[#allocation15 + $0x10] sm:$0xff]  ;;  %v1463_v20 = vld [vmem:[#allocation15 + $0x8] sm:$0xff] }
 0x555   : > { %v1462_v21 = vld [vmem:[#allocation15] sm:$0xff] }
 0x556   : > { %v1391_v52 = vld [vmem:[#allocation5 + $0x40] sm:$0xff]  ;;  %v1393_v53 = vld [vmem:[#allocation5 + $0x50] sm:$0xff]  ;;  %v1392_v57 = vld [vmem:[#allocation5 + $0x48] sm:$0xff]  ;;  %2165 = vmatpush3.xpose.msra.mxu0 %v1476_v3  ;;  %2249 = vmatpush3.xpose.msra.mxu1 %v1476_v3 }
 0x557   : > { %v1386_v54 = vld [vmem:[#allocation5 + $0x20] sm:$0xff]  ;;  %v2453_v55 = vpack.i.bf16 %v1393_v53, %v1391_v52  ;;  %v1388_v56 = vld [vmem:[#allocation5 + $0x30] sm:$0xff]  ;;  %v1394_v58 = vld [vmem:[#allocation5 + $0x58] sm:$0xff]  ;;  %2166 = vmatprep.subr.mxu0 %v1475_v8  ;;  %2234 = vmatprep.subr.mxu1 %v1475_v8 }
 0x558   : > { %v2443_v59 = vpack.i.bf16 %v1388_v56, %v1386_v54  ;;  %v1387_v60 = vld [vmem:[#allocation5 + $0x28] sm:$0xff]  ;;  %v1389_v61 = vld [vmem:[#allocation5 + $0x38] sm:$0xff]  ;;  %v2458_v62 = vpack.i.bf16 %v1394_v58, %v1392_v57  ;;  %v1396_v4 = vld [vmem:[#allocation5 + $0x60] sm:$0xff] }
 0x559   : > { %2454 = vrot.lane.b32.xlu1 %v2453_v55, %s2820_s21  ;;  %v1397_v63 = vld [vmem:[#allocation5 + $0x68] sm:$0xff]  ;;  %v2448_v0 = vpack.i.bf16 %v1389_v61, %v1387_v60  ;;  %v1399_v1 = vld [vmem:[#allocation5 + $0x78] sm:$0xff]  ;;  %v1398_v5 = vld [vmem:[#allocation5 + $0x70] sm:$0xff] }
 0x55a   : > { %2444 = vrot.lane.b32.xlu0 %v2443_v59, %s2821_s19  ;;  %v2468_v6 = vpack.i.bf16 %v1399_v1, %v1397_v63  ;;  %v2463_v7 = vpack.i.bf16 %v1398_v5, %v1396_v4  ;;  %2167 = vmatpush3.xpose.msra.mxu0 %v1475_v8  ;;  %v1381_v26 = vld [vmem:[#allocation5] sm:$0xff]  ;;  %v1383_v28 = vld [vmem:[#allocation5 + $0x10] sm:$0xff]  ;;  %v1382_v30 = vld [vmem:[#allocation5 + $0x8] sm:$0xff] }
 0x55b   : > { %2250 = vmatpush3.xpose.msra.mxu1 %v1475_v8  ;;  %2168 = vmatprep.subr.mxu0 %v1474_v9  ;;  %v1384_v31 = vld [vmem:[#allocation5 + $0x18] sm:$0xff]  ;;  %v1910_v56 = vld [vmem:[%s3532_s24] ss:$0 sm:$0xff]  ;;  %v1571_v59 = vld [vmem:[%s3124_s15 + $0x8] sm:$0xff] }
 0x55c   : > { %2235 = vmatprep.subr.mxu1 %v1474_v9  ;;  %v1570_v63 = vld [vmem:[%s3124_s15] sm:$0xff]  ;;  %v1572_v4 = vld [vmem:[%s3124_s15 + $0x10] sm:$0xff] }
 0x55d   : > { %2459 = vrot.lane.b32.xlu1 %v2458_v62, %s2820_s21 }
 0x55e   : > { %2449 = vrot.lane.b32.xlu0 %v2448_v0, %s2821_s19  ;;  %2169 = vmatpush3.xpose.msra.mxu0 %v1474_v9 }
 0x55f   : > { %2251 = vmatpush3.xpose.msra.mxu1 %v1474_v9  ;;  %2170 = vmatprep.subr.mxu0 %v1473_v10 }
 0x560   : > { %2236 = vmatprep.subr.mxu1 %v1473_v10 }
 0x561   : > { %2469 = vrot.lane.b32.xlu1 %v2468_v6, %s2822_s2 }
 0x562   : > { %2464 = vrot.lane.b32.xlu0 %v2463_v7, %s2822_s2  ;;  %2171 = vmatpush3.xpose.msra.mxu0 %v1473_v10  ;;  %v1573_v7 = vld [vmem:[%s3124_s15 + $0x18] sm:$0xff] }
 0x563   : > { %2252 = vmatpush3.xpose.msra.mxu1 %v1473_v10  ;;  %2172 = vmatprep.subr.mxu0 %v1472_v11 }
 0x564   : > { %2237 = vmatprep.subr.mxu1 %v1472_v11 }
 0x566   : > { %2173 = vmatpush3.xpose.msra.mxu0 %v1472_v11 }
 0x567   : > { %2253 = vmatpush3.xpose.msra.mxu1 %v1472_v11  ;;  %2174 = vmatprep.subr.mxu0 %v1471_v12 }
 0x568   : > { %2238 = vmatprep.subr.mxu1 %v1471_v12 }
 0x56a   : > { %2175 = vmatpush3.xpose.msra.mxu0 %v1471_v12 }
 0x56b   : > { %2254 = vmatpush3.xpose.msra.mxu1 %v1471_v12  ;;  %2176 = vmatprep.subr.mxu0 %v1470_v13 }
 0x56c   : > { %2239 = vmatprep.subr.mxu1 %v1470_v13 }
 0x56e   : > { %2177 = vmatpush3.xpose.msra.mxu0 %v1470_v13 }
 0x56f   : > { %2255 = vmatpush3.xpose.msra.mxu1 %v1470_v13  ;;  %2178 = vmatprep.subr.mxu0 %v1469_v14 }
 0x570   : > { %2240 = vmatprep.subr.mxu1 %v1469_v14 }
 0x572   : > { %2179 = vmatpush3.xpose.msra.mxu0 %v1469_v14 }
 0x573   : > { %2256 = vmatpush3.xpose.msra.mxu1 %v1469_v14  ;;  %2180 = vmatprep.subr.mxu0 %v1468_v15 }
 0x574   : > { %2241 = vmatprep.subr.mxu1 %v1468_v15 }
 0x576   : > { %2181 = vmatpush3.xpose.msra.mxu0 %v1468_v15 }
 0x577   : > { %2257 = vmatpush3.xpose.msra.mxu1 %v1468_v15  ;;  %2182 = vmatprep.subr.mxu0 %v1467_v16 }
 0x578   : > { %2242 = vmatprep.subr.mxu1 %v1467_v16 }
 0x57a   : > { %2183 = vmatpush3.xpose.msra.mxu0 %v1467_v16 }
 0x57b   : > { %2258 = vmatpush3.xpose.msra.mxu1 %v1467_v16  ;;  %2184 = vmatprep.subr.mxu0 %v1466_v17 }
 0x57c   : > { %2243 = vmatprep.subr.mxu1 %v1466_v17 }
 0x57e   : > { %2185 = vmatpush3.xpose.msra.mxu0 %v1466_v17 }
 0x57f   : > { %2259 = vmatpush3.xpose.msra.mxu1 %v1466_v17  ;;  %2186 = vmatprep.subr.mxu0 %v1465_v18 }
 0x580   : > { %2244 = vmatprep.subr.mxu1 %v1465_v18 }
 0x582   : > { %2187 = vmatpush3.xpose.msra.mxu0 %v1465_v18 }
 0x583   : > { %2260 = vmatpush3.xpose.msra.mxu1 %v1465_v18  ;;  %2188 = vmatprep.subr.mxu0 %v1464_v19 }
 0x584   : > { %2245 = vmatprep.subr.mxu1 %v1464_v19 }
 0x586   : > { %2189 = vmatpush3.xpose.msra.mxu0 %v1464_v19 }
 0x587   : > { %2261 = vmatpush3.xpose.msra.mxu1 %v1464_v19  ;;  %2190 = vmatprep.subr.mxu0 %v1463_v20 }
 0x588   : > { %2246 = vmatprep.subr.mxu1 %v1463_v20 }
 0x58a   : > { %2191 = vmatpush3.xpose.msra.mxu0 %v1463_v20 }
 0x58b   : > { %2262 = vmatpush3.xpose.msra.mxu1 %v1463_v20  ;;  %2192 = vmatprep.subr.mxu0 %v1462_v21 }
 0x58c   : > { %2247 = vmatprep.subr.mxu1 %v1462_v21 }
 0x58e   : > { %2193 = vmatpush3.xpose.msra.mxu0 %v1462_v21 }
 0x58f   : > { %2263 = vmatpush3.xpose.msra.mxu1 %v1462_v21 }
 0x5cb   : > { %v2455_v22 = vpop.permute.xlu1 %2454 }
 0x5cc   : > { %v2445_v23 = vpop.permute.xlu0 %2444  ;;  %v2457_v36 = vunpack.i.h.bf16 %v2455_v22  ;;  %v2456_v37 = vunpack.i.l.bf16 %v2455_v22 }
 0x5cd   : > { %v2447_v24 = vunpack.i.h.bf16 %v2445_v23  ;;  %v2446_v25 = vunpack.i.l.bf16 %v2445_v23 }
 0x5cf   : > { %v2460_v27 = vpop.permute.xlu1 %2459  ;;  %v1448_v38 = vsel %vm1102_vm1, %v1381_v26, %v2446_v25  ;;  %v1450_v39 = vsel %vm1102_vm1, %v1383_v28, %v2447_v24 }
 0x5d0   : > { %v2450_v29 = vpop.permute.xlu0 %2449  ;;  %v2462_v32 = vunpack.i.h.bf16 %v2460_v27  ;;  %v2461_v33 = vunpack.i.l.bf16 %v2460_v27  ;;  %v1453_v50 = vsel %vm1452_vm2, %v1448_v38, %v2456_v37  ;;  %v1455_v51 = vsel %vm1452_vm2, %v1450_v39, %v2457_v36  ;;  %v1911_v38 = vld [vmem:[%s3533_s20] ss:$0 sm:$0xff] }
 0x5d1   : > { %v2452_v34 = vunpack.i.h.bf16 %v2450_v29  ;;  %v2451_v35 = vunpack.i.l.bf16 %v2450_v29 }
 0x5d3   : > { %v1449_v40 = vsel %vm1102_vm1, %v1382_v30, %v2451_v35  ;;  %v1451_v41 = vsel %vm1102_vm1, %v1384_v31, %v2452_v34  ;;  %v2470_v42 = vpop.permute.xlu1 %2469 }
 0x5d4   : > { %v2472_v43 = vunpack.i.h.bf16 %v2470_v42  ;;  %v2471_v44 = vunpack.i.l.bf16 %v2470_v42  ;;  %v2465_v45 = vpop.permute.xlu0 %2464  ;;  %v1454_v48 = vsel %vm1452_vm2, %v1449_v40, %v2461_v33  ;;  %v1456_v49 = vsel %vm1452_vm2, %v1451_v41, %v2462_v32  ;;  %v1912_v41 = vld [vmem:[%s3534_s4] ss:$0 sm:$0xff] }
 0x5d5   : > { %v2467_v46 = vunpack.i.h.bf16 %v2465_v45  ;;  %v2466_v47 = vunpack.i.l.bf16 %v2465_v45 }
 0x5d6   : > { %v1459_v52 = vsel %vm1457_vm3, %v1454_v48, %v2471_v44  ;;  %v1461_v53 = vsel %vm1457_vm3, %v1456_v49, %v2472_v43 }
 0x5d7   : > { %v1458_v54 = vsel %vm1457_vm3, %v1453_v50, %v2466_v47  ;;  %v1460_v55 = vsel %vm1457_vm3, %v1455_v51, %v2467_v46 }
 0x5d8   : > { %2194 = vmatprep.mubr.f32.mxu0 %v1458_v54  ;;  %2197 = vmatprep.mubr.f32.mxu1 %v1460_v55 }
 0x5d9   : > { %2195 = vmatmul.mubr.f32.vlgmr.msra.gmra.mxu0 %v1459_v52  ;;  %2198 = vmatmul.mubr.f32.vlgmr.msra.gmra.mxu1 %v1461_v53 }
 0x699   : > { %v2196_v57 = vpop.f32.mrf.mxu0  ;;  %v2199_v58 = vpop.f32.mrf.mxu1 }
 0x69a   : > { %v1557_v60 = vadd.f32 %v2196_v57, %v1910_v56  ;;  %v1567_v5 = vadd.f32 %v2199_v58, %v1910_v56 }
 0x69b   : > { %v1551_v61 = vpop.f32.mrf.mxu0  ;;  %v1561_v62 = vpop.f32.mrf.mxu1 }
 0x69c   : > { %v1552_v0 = vadd.f32 %v1910_v56, %v1551_v61  ;;  %v1575_v1 = vadd.f32 %v1571_v59, %v1557_v60  ;;  %v1562_v2 = vadd.f32 %v1910_v56, %v1561_v62  ;;  %v1577_v8 = vadd.f32 %v1573_v7, %v1567_v5 }
 0x69e   : > { %1580 = vadd.xlane.f32.xlu1 %v1575_v1  ;;  %v1574_v3 = vadd.f32 %v1570_v63, %v1552_v0  ;;  %v1576_v6 = vadd.f32 %v1572_v4, %v1562_v2 }
 0x6a0   : > { %1578 = vadd.xlane.f32.xlu0 %v1574_v3 }
 0x6a4   : > { %1582 = vadd.xlane.f32.xlu0 %v1576_v6 }
 0x6a8   : > { %1584 = vadd.xlane.f32.xlu0 %v1577_v8 }
 0x727   : > { %v1581_v9 = vpop.xlane.xlu1 %1580 }
 0x728   : > { %v1588_v10 = vmul.f32 0.0078125, %v1581_v9 }
 0x729   : > { %v1579_v11 = vpop.xlane.xlu0 %1578 }
 0x72a   : > { %v1592_v12 = vsub.f32 %v1575_v1, %v1588_v10  ;;  %v1587_v13 = vmul.f32 0.0078125, %v1579_v11 }
 0x72c   : > { %v1591_v14 = vsub.f32 %v1574_v3, %v1587_v13  ;;  %v1596_v15 = vmul.f32 %v1592_v12, %v1592_v12 }
 0x72d   : > { %v1583_v16 = vpop.xlane.xlu0 %1582 }
 0x72e   : > { %v1589_v17 = vmul.f32 0.0078125, %v1583_v16  ;;  %1601 = vadd.xlane.f32.xlu0 %v1596_v15  ;;  %v1595_v18 = vmul.f32 %v1591_v14, %v1591_v14 }
 0x730   : > { %v1593_v19 = vsub.f32 %v1576_v6, %v1589_v17  ;;  %1599 = vadd.xlane.f32.xlu1 %v1595_v18 }
 0x731   : > { %v1585_v20 = vpop.xlane.xlu0 %1584 }
 0x732   : > { %v1590_v21 = vmul.f32 0.0078125, %v1585_v20  ;;  %v1597_v22 = vmul.f32 %v1593_v19, %v1593_v19 }
 0x734   : > { %v1594_v23 = vsub.f32 %v1577_v8, %v1590_v21  ;;  %1603 = vadd.xlane.f32.xlu1 %v1597_v22 }
 0x736   : > { %v1598_v24 = vmul.f32 %v1594_v23, %v1594_v23 }
 0x738   : > { %1605 = vadd.xlane.f32.xlu0 %v1598_v24 }
 0x7b7   : > { %v1602_v25 = vpop.xlane.xlu0 %1601 }
 0x7b8   : > { %v1608_v26 = vmul.f32 0.0078125, %v1602_v25 }
 0x7b9   : > { %v1600_v27 = vpop.xlane.xlu1 %1599 }
 0x7ba   : > { %v1612_v28 = vadd.f32 1e-12, %v1608_v26  ;;  %v1607_v29 = vmul.f32 0.0078125, %v1600_v27 }
 0x7bc   : > { %2473 = vrsqrt.f32 %v1612_v28  ;;  %v1611_v30 = vadd.f32 1e-12, %v1607_v29 }
 0x7bd   : > { %v1604_v31 = vpop.xlane.xlu1 %1603 }
 0x7be   : > { %2475 = vrsqrt.f32 %v1611_v30  ;;  %v1609_v32 = vmul.f32 0.0078125, %v1604_v31 }
 0x7c0   : > { %v1613_v33 = vadd.f32 1e-12, %v1609_v32 }
 0x7c1   : > { %v1606_v34 = vpop.xlane.xlu0 %1605 }
 0x7c2   : > { %2477 = vrsqrt.f32 %v1613_v33  ;;  %v1610_v35 = vmul.f32 0.0078125, %v1606_v34 }
 0x7c4   : > { %v1614_v36 = vadd.f32 1e-12, %v1610_v35 }
 0x7c6   : > { %2479 = vrsqrt.f32 %v1614_v36 }
 0x7c9   : > { %v2474_v37 = vpop.eup %2473 }
 0x7ca   : > { %v1620_v39 = vmul.f32 %v2474_v37, %v1592_v12 }
 0x7cb   : > { %v2476_v40 = vpop.eup %2475 }
 0x7cc   : > { %v1631_v42 = vmul.f32 %v1911_v38, %v1620_v39  ;;  %v1619_v43 = vmul.f32 %v2476_v40, %v1591_v14 }
 0x7ce   : > { %v1642_v44 = vadd.f32 %v1912_v41, %v1631_v42  ;;  %v1630_v45 = vmul.f32 %v1911_v38, %v1619_v43 }
 0x7cf   : > { %v2478_v46 = vpop.eup %2477 }
 0x7d0   : > { %1646 = vst [vmem:[%s3151_s11 + $0x8] sm:$0xff] %v1642_v44  ;;  %v1641_v47 = vadd.f32 %v1912_v41, %v1630_v45  ;;  %v1621_v48 = vmul.f32 %v2478_v46, %v1593_v19 }
 0x7d2   : > { %1645 = vst [vmem:[%s3151_s11] sm:$0xff] %v1641_v47  ;;  %v1632_v49 = vmul.f32 %v1911_v38, %v1621_v48 }
 0x7d3   : > { %v2480_v50 = vpop.eup %2479 }
 0x7d4   : > { %v1643_v51 = vadd.f32 %v1912_v41, %v1632_v49  ;;  %v1622_v52 = vmul.f32 %v2480_v50, %v1594_v23 }
 0x7d6   : > { %1647 = vst [vmem:[%s3151_s11 + $0x10] sm:$0xff] %v1643_v51  ;;  %v1633_v53 = vmul.f32 %v1911_v38, %v1622_v52 }
 0x7d8   : > { %v1644_v54 = vadd.f32 %v1912_v41, %v1633_v53 }
 0x7da   : > { %1648 = vst [vmem:[%s3151_s11 + $0x18] sm:$0xff] %v1644_v54 }
 0x7db PF: > { %s3535_s25 = sld [smem:[#allocation30_spill]]  ;;  %s1668_s2 = sshll.u32 %s3151_s11, 4  ;;  %s3346_s2 = int_to_ptr.vmem [resolvable:$true] %s1668_s2 }
 0x7dc   : > { %s3537_s28 = sld [smem:[#allocation49_spill]]  ;;  %s1650_s13 = scalar_lea.sflag [#allocation8], %s3120_s0 }
 0x7dd   : > { %s2641_s10 = scalar_lea.vmem %s3346_s2, 512  ;;  %s2823_s24 = smov [#allocation17]  }
 0x7de   : > { %p2642_p2 = scmp.ne.s32.totalorder %s3346_s2, %s2641_s10  ;;  %s2645_s15 = sshll.u32 %s2823_s24, 4  ;;  %s2646_s15 = int_to_ptr.vmem [resolvable:$false] %s2645_s15 }
 0x7df   : > { %s2647_s9 = scalar_lea.vmem %s2646_s15, 1024  ;;  %p2648_p12 = scmp.lt.s32.totalorder %s3346_s2, %s2646_s15 }
 0x7e0   : > { %p2643_p8 = pnand %p2642_p2, %p3056_p7  ;;  %p2649_p1 = scmp.lt.s32.totalorder %s2647_s9, %s2641_s10 }
 0x7e1   : > { %s1923_s16 = sshll.u32 %s3535_s25, 9 }
 0x7e2   : > { %s3538_s21 = smov %s3537_s28  ;;  %s3343_s19 = scalar_lea.hbm %s3537_s28, %s1923_s16 }
 0x7e3   : > { %p2644_p10 = pneg %p2643_p8  ;;  %p2650_p3 = por %p2649_p1, %p2648_p12 }
 0x7e5   : > { %p2651_p13 = pnand %p2650_p3, %p2644_p10 }
 0x7e7   : > { %2654 = shalt.err (!%p2651_p13)
}
 0x7e8   : > { %s2655_s11 = scalar_lea.hbm %s3343_s19, 512  ;;  %s2659_s22 = scalar_lea.hbm %s3538_s21, 1024 }
 0x7e9   : > { %p2656_p6 = scmp.ne.s32.totalorder %s3343_s19, %s2655_s11  ;;  %p2660_p11 = scmp.lt.s32.totalorder %s3343_s19, %s3538_s21 }
 0x7ea   : > { %p2661_p2 = scmp.lt.s32.totalorder %s2659_s22, %s2655_s11 }
 0x7eb   : > { %p2657_p0 = pnand %p2656_p6, %p3056_p7 }
 0x7ec   : > { %p2662_p8 = por %p2661_p2, %p2660_p11 }
 0x7ed   : > { %p2658_p4 = pneg %p2657_p0 }
 0x7ef   : > { %p2663_p10 = pnand %p2662_p8, %p2658_p4 }
 0x7f1   : > { %2666 = shalt.err (!%p2663_p10)
}
 0x7f2   : > { %s2824_s5 = smov 128   ;;  %s2825_s28 = smov 8  }
 0x7f3   : > { %2284 = dma.vmem_to_hbm [thread:$0]  (%p3056_p7), %s3346_s2, 512, %s3343_s19, %s1650_s13, %s2824_s5, %s2824_s5, %s2825_s28  }
 0x7f4   : > { %s1917_s10 = sshll.u32 %s2791_s14, 2  ;;  %s1918_s24 = sshll.u32 %s3535_s25, 4 }
 0x7f5   : > { %s1683_s15 = sadd.s32 %s1918_s24, %s1917_s10  ;;  %s1686_s9 = sshll.u32 %s3153_s23, 4  ;;  %s3377_s9 = int_to_ptr.vmem [resolvable:$true] %s1686_s9 }
 0x7f6   : > { %s1919_s11 = sshll.u32 %s1683_s15, 7  ;;  %s3540_s22 = sld [smem:[#allocation50_spill]] }
 0x7f7   : > { %s1655_s7 = scalar_lea.sflag [#allocation19], %s573_s30  ;;  %s2667_s16 = scalar_lea.vmem %s3377_s9, 512 }
 0x7f8   : > { %p2668_p12 = scmp.ne.s32.totalorder %s3377_s9, %s2667_s16  ;;  %s2826_s14 = smov [#allocation18]  }
 0x7f9   : > { %s2671_s0 = sshll.u32 %s2826_s14, 4  ;;  %s2672_s0 = int_to_ptr.vmem [resolvable:$false] %s2671_s0 }
 0x7fa   : > { %p2669_p7 = pnand %p2668_p12, %p2978_p9  ;;  %s2673_s23 = scalar_lea.vmem %s2672_s0, 1024 }
 0x7fb   : > { %p2674_p3 = scmp.lt.s32.totalorder %s3377_s9, %s2672_s0  ;;  %p2675_p13 = scmp.lt.s32.totalorder %s2673_s23, %s2667_s16 }
 0x7fc   : > { %s3382_s4 = scalar_lea.hbm %s3540_s22, %s1919_s11  ;;  %p2670_p1 = pneg %p2669_p7 }
 0x7fd   : > { %p2676_p6 = por %p2675_p13, %p2674_p3 }
 0x7ff   : > { %p2677_p0 = pnand %p2676_p6, %p2670_p1 }
 0x801   : > { %2680 = shalt.err (!%p2677_p0)
}
 0x802   : > { %s2681_s25 = scalar_lea.hbm %s3382_s4, 512  ;;  %s2685_s2 = scalar_lea.hbm %s3540_s22, 4096 }
 0x803   : > { %p2682_p4 = scmp.ne.s32.totalorder %s3382_s4, %s2681_s25  ;;  %p2686_p8 = scmp.lt.s32.totalorder %s3382_s4, %s3540_s22 }
 0x804   : > { %p2687_p10 = scmp.lt.s32.totalorder %s2685_s2, %s2681_s25 }
 0x805   : > { %p2683_p11 = pnand %p2682_p4, %p2978_p9 }
 0x806   : > { %p2688_p12 = por %p2687_p10, %p2686_p8 }
 0x807   : > { %p2684_p2 = pneg %p2683_p11 }
 0x809   : > { %p2689_p7 = pnand %p2688_p12, %p2684_p2 }
 0x80b   : > { %2692 = shalt.err (!%p2689_p7)
}
 0x80c   : > { %2285 = dma.vmem_to_hbm [thread:$0]  (%p2978_p9), %s3377_s9, 512, %s3382_s4, %s1655_s7, %s2824_s5, %s2824_s5, %s2825_s28  }
 0x80d PF: > { %s3541_s24 = sld [smem:[#allocation28_spill]]  ;;  %p2324_p1 = scmp.ge.s32.totalorder %s2807_s18, 2 }
 0x80f   : > { %p2309_p3 = pnand %p2324_p1, %p2967_p5 }
 0x811   : > { %p2310_p13 = pneg %p2309_p3 }
 0x813   : > { %s1701_s11 = sand.u32 1, %s3541_s24  }
 0x814   : > { %s1702_s20 = scalar_lea.sflag [#allocation8], %s1701_s11 }
 0x815   : > { %2758 = dma.done.wait (%p2310_p13), %s1702_s20, 512  }
 0x816   : > { %2760 = vsyncadd (%p2310_p13), %s1702_s20, 4294966784  ;;  %s3543_s8 = sld [smem:[#allocation27_spill]] }
 0x817   : > { %s3544_s12 = sld [smem:[#allocation34_spill]] }
 0x81c   : > { %s1710_s16 = sand.u32 1, %s3543_s8  }
 0x81d   : > { %p3545_p6 = scmp.ne.s32.totalorder %s3544_s12, 0  ;;  %s1711_s14 = scalar_lea.sflag [#allocation19], %s1710_s16 }
 0x81f   : > { %p2312_p0 = pnand %p2324_p1, %p3545_p6 }
 0x821   : > { %p2313_p4 = pneg %p2312_p0 }
 0x823   : > { %2762 = dma.done.wait (%p2313_p4), %s1711_s14, 512  }
 0x824   : > { %2764 = vsyncadd (%p2313_p4), %s1711_s14, 4294966784  ;;  %s38_s18 = sadd.s32 1, %s2807_s18   ;;  %s3546_s5 = sld [smem:[#allocation29_spill]] }
 0x825   : > { %p35_p9 = scmp.ge.s32.totalorder %s38_s18, 10   ;;  %s3547_s30 = sld [smem:[#allocation38_spill]] }
 0x826   : > { %s3548_s14 = sld [smem:[#allocation31_spill]]  ;;  %s3551_s25 = smov %s2771_s26 }
 0x827   : > { %s3549_s16 = sld [smem:[#allocation35_spill]]  ;;  %s3552_s26 = smov %s2775_s27 }
 0x828   : > { %s3550_s9 = sld [smem:[#allocation37_spill]]  ;;  %s3553_s27 = smov %s3082_s6 }
 0x829   : > { %s3554_s28 = smov %s2783_s29  ;;  %s3556_s15 = smov %s2803_s17 }
 0x82a   : > { %s3555_s29 = smov %s3546_s5  ;;  %37 = sbr.rel (!%p35_p9) target bundleno = 28 (0x1c), region = 183 }
 0x82e   : > { %s3557_s17 = smov %s3550_s9 }
 0x82f   :  { %1716 = vsyncpa [#allocation7], 1 }
 0x830   :  { %1718 = vsyncpa [#allocation7 + $0x1], 1 }
 0x831   :  { %1719 = vsyncpa [#allocation10], 1 }
 0x832   :  { %1721 = vsyncpa [#allocation10 + $0x1], 1 }
 0x833   :  { %1722 = vsyncpa [#allocation13], 1 }
 0x834   :  { %1723 = vsyncpa [#allocation16], 1 }
 0x835   :  { %1724 = vsyncpa [#allocation8], 1 }
 0x836   :  { %1726 = vsyncpa [#allocation8 + $0x1], 1 }
 0x837   :  { %1727 = vsyncpa [#allocation19], 1 }
 0x838   :  { %1729 = vsyncpa [#allocation19 + $0x1], 1 }

</bundles_post_ra>
